<compile_context>
chip_gen: v7x
topology: tpu7x:2x2x1
jax: 0.10.0
libtpu: 0.0.40
codegen_flags: <defaults>
</compile_context>

<pallas_src>
import functools
import math

import jax
import jax.numpy as jnp
from jax.experimental import pallas as pl
from jax.experimental.pallas import tpu as pltpu


# ---------------------------------------------------------------------------
# Kernel
# ---------------------------------------------------------------------------
def _candidate_attention_kernel(*refs, has_mask: bool, n_valid: int, tanh_dtype):
    if has_mask:
        f_ref, q_ref, m_ref, wf_ref, wq_ref, bq_ref, wa_ref, out_ref = refs
    else:
        f_ref, q_ref, wf_ref, wq_ref, bq_ref, wa_ref, out_ref = refs
        m_ref = None

    f = f_ref[...]                                   # (BB, Np, F) bf16
    bb, n, fd = f.shape

    # feature_affine (no bias): one (BB*Np, F) x (F, A) MXU matmul, bf16 in,
    # f32 accumulate.  Np is a multiple of 16 so this reshape is layout-free.
    fa = jnp.dot(f.reshape(bb * n, fd), wf_ref[...],
                 preferred_element_type=jnp.float32)                  # (BB*Np, A)
    # query_affine (bias) on the MXU.
    qa = jnp.dot(q_ref[...], wq_ref[...],
                 preferred_element_type=jnp.float32) + bq_ref[...]    # (BB, A)

    a_dim = fa.shape[-1]
    z = fa.reshape(bb, n, a_dim) + qa[:, None, :]                     # (BB, Np, A) f32

    # tanh on the EUP: bf16 on v6e/v7x (2x throughput, half the temp), f32 on v5e.
    t = jnp.tanh(z.astype(tanh_dtype))

    # attention_affine: A is small, so VPU multiply by the Wa row + lane reduce.
    # keepdims keeps the scores in their natural (BB, Np, 1) sublane layout
    # (candidates on sublanes) -> no relayout before the softmax.
    s = jnp.sum(t.astype(jnp.float32) * wa_ref[...], axis=-1,
                keepdims=True)                                        # (BB, Np, 1) f32

    if has_mask:
        # mask is 0/1 f32 (0 => masked), matching masked_fill(mask == 0, -1e9).
        m3 = m_ref[...][:, :, None]                                   # (BB, Np, 1)
        s = jnp.where(m3 == 0.0, jnp.float32(-1e9), s)
    elif n_valid < n:
        # Candidate axis was padded and there is no user mask: mask the pad rows
        # with a static iota so they get zero softmax weight.
        idx = jax.lax.broadcasted_iota(jnp.int32, (bb, n, 1), 1)
        s = jnp.where(idx < n_valid, s, jnp.float32(-1e9))

    # softmax over the candidate (sublane) axis, batched over BB.
    s_max = jnp.max(s, axis=1, keepdims=True)                         # (BB, 1, 1)
    e = jnp.exp(s - s_max)                                            # (BB, Np, 1)
    den = jnp.sum(e, axis=1, keepdims=True)                           # (BB, 1, 1)
    alpha = e * pl.reciprocal(den, approx=True)                       # (BB, Np, 1) f32

    # bmm(alpha[:,None,:], feature): bf16 VPU broadcast-multiply + f32 sublane
    # reduce -- no f32 duplicate of the feature block, no M=1 MXU matmul.
    w = (f * alpha.astype(jnp.bfloat16)).astype(jnp.float32)          # (BB, Np, F)
    out_ref[...] = jnp.sum(w, axis=1).astype(out_ref.dtype)           # (BB, F)


# ---------------------------------------------------------------------------
# Hardware query / block sizing
# ---------------------------------------------------------------------------
def _round_up(x, m):
    return -(-x // m) * m


def _tpu_generation_and_vmem():
    """(generation number, usable VMEM bytes per TensorCore), with safe fallbacks."""
    kind = ""
    try:
        kind = jax.devices()[0].device_kind.lower()
    except Exception:
        pass
    gen = 6
    for g in (7, 6, 5, 4):
        if f"v{g}" in kind:
            gen = g
            break
    vmem = None
    try:
        vmem = int(pltpu.get_tpu_info().vmem_capacity_bytes)
    except Exception:
        vmem = None
    if not vmem:
        vmem = (64 << 20) if gen >= 7 else (128 << 20)
    if gen >= 7:
        vmem = min(vmem, 64 << 20)      # v7x: 64 MiB per TensorCore
    return gen, min(vmem, 128 << 20)


def _per_step_vmem_bytes(bb, n_pad, f_dim, q_dim, a_dim, has_mask, tanh_bytes,
                         out_bytes):
    """Conservative per-grid-step VMEM footprint (lane/sublane padded): the
    double-buffered streamed blocks, single-buffered weights and the f32
    score/tanh intermediates that are live alongside the feature block."""
    lane = lambda d: _round_up(d, 128)
    sub = lambda d: _round_up(d, 8)
    feat = 2 * bb * n_pad * lane(f_dim) * 2                   # bf16 feature, x2 bufs
    qblk = 2 * sub(bb) * lane(q_dim) * 2                      # bf16 query,   x2 bufs
    outb = 2 * sub(bb) * lane(f_dim) * out_bytes              # output,       x2 bufs
    mblk = 2 * sub(bb) * lane(n_pad) * 4 if has_mask else 0   # f32 mask,     x2 bufs
    inter = (bb * n_pad * lane(a_dim) * (4 + 4 + tanh_bytes)  # fa, fa+qa, tanh
             + bb * n_pad * lane(f_dim) * 2)                  # bf16 weighted feature
    wts = (sub(f_dim) + sub(q_dim)) * lane(a_dim) * 2 + 2 * 8 * lane(a_dim) * 4
    return feat + qblk + outb + mblk + inter + wts


def _choose_block_b(batch, n_pad, f_dim, q_dim, a_dim, has_mask, tanh_bytes,
                    out_bytes, vmem_budget, min_steps):
    """Largest multiple-of-8 batch block whose per-step footprint fits the VMEM
    budget, shrunk (when possible) so at least `min_steps` grid steps exist
    (>= 2 per TensorCore on v7x's two-core chips)."""
    cap = max(8, min(1024, _round_up(batch, 8)))
    bb = 8
    for cand in range(cap, 7, -8):
        if _per_step_vmem_bytes(cand, n_pad, f_dim, q_dim, a_dim, has_mask,
                                tanh_bytes, out_bytes) <= vmem_budget:
            bb = cand
            break
    while bb > 8 and pl.cdiv(batch, bb) < min_steps:
        bb -= 8
    return bb


# ---------------------------------------------------------------------------
# Wrapper
# ---------------------------------------------------------------------------
def candidate_attention(feature, query, wf, wq, bq, wa, mask=None, block_b=None):
    """feature: (B, N, F), query: (B, Q), mask: optional (B, N) (nonzero = keep).

    Weights are pre-transposed for right-multiplication:
      wf: (F, A) = feature_affine.weight^T,  wq: (Q, A) = query_affine.weight^T,
      bq: (A,)   = query_affine.bias,        wa: (A, 1) = attention_affine.weight^T
    Returns (B, F) in feature.dtype.
    """
    B, N, F = feature.shape
    Q = query.shape[1]
    A = wf.shape[1]
    out_dtype = feature.dtype
    out_bytes = jnp.dtype(out_dtype).itemsize
    has_mask = mask is not None

    gen, vmem_cap = _tpu_generation_and_vmem()
    # v5e has no bf16 EUP -> keep tanh in f32 there; bf16 tanh on v6e/v7x.
    tanh_dtype = jnp.float32 if gen <= 5 else jnp.bfloat16
    tanh_bytes = jnp.dtype(tanh_dtype).itemsize
    vmem_budget = (vmem_cap * 3) // 8            # ~24 MiB (v7x) / ~48 MiB (v5e/v6e)
    vmem_limit = min(64 << 20, (vmem_cap * 3) // 4)
    min_steps = 4 if gen >= 7 else 2             # >= 2 steps per v7x TensorCore

    # Pad candidates to a multiple of 16 (bf16 sublane packing) so the in-kernel
    # reshapes are layout-free; pad the batch to a multiple of the block so
    # awkward B still pipelines / splits across cores.
    Np = _round_up(N, 16)
    if block_b is None:
        block_b = _choose_block_b(B, Np, F, Q, A, has_mask, tanh_bytes,
                                  out_bytes, vmem_budget, min_steps)
    Bp = _round_up(B, block_b)
    grid = (Bp // block_b,)

    # bf16 operands for the MXU/VPU streams; softmax / accumulation stay in f32.
    f16 = feature.astype(jnp.bfloat16)
    q16 = query.astype(jnp.bfloat16)
    if Bp != B or Np != N:
        f16 = jnp.pad(f16, ((0, Bp - B), (0, Np - N), (0, 0)))
    if Bp != B:
        q16 = jnp.pad(q16, ((0, Bp - B), (0, 0)))
    wf16 = wf.astype(jnp.bfloat16)
    wq16 = wq.astype(jnp.bfloat16)
    bq2 = bq.reshape(1, A).astype(jnp.float32)
    wa3 = wa.reshape(1, 1, A).astype(jnp.float32)

    inputs = [f16, q16]
    stream_specs = [
        pl.BlockSpec((block_b, Np, F), lambda b: (b, 0, 0)),   # feature (per block)
        pl.BlockSpec((block_b, Q), lambda b: (b, 0)),          # query   (per block)
    ]
    if has_mask:
        m = (mask.reshape(B, N) != 0).astype(jnp.float32)      # robust 0/1 mask
        if Bp != B or Np != N:
            m = jnp.pad(m, ((0, Bp - B), (0, Np - N)))         # pads are masked out
        inputs.append(m)
        stream_specs.append(pl.BlockSpec((block_b, Np), lambda b: (b, 0)))
    inputs += [wf16, wq16, bq2, wa3]

    kernel = functools.partial(_candidate_attention_kernel, has_mask=has_mask,
                               n_valid=N, tanh_dtype=tanh_dtype)

    flops = (2 * Bp * Np * F * A + 2 * Bp * Q * A
             + 2 * Bp * Np * A + 2 * Bp * Np * F)
    transcendentals = Bp * Np * A + Bp * Np
    bytes_accessed = ((f16.size + q16.size + wf16.size + wq16.size) * 2
                      + Bp * F * out_bytes
                      + (Bp * Np * 4 if has_mask else 0)
                      + (bq2.size + wa3.size) * 4)

    def _run(single_buffer_weights):
        kw = {"pipeline_mode": pl.Buffered(1)} if single_buffer_weights else {}
        # Grid-invariant weights: constant index_map, single-buffered if possible.
        weight_specs = [
            pl.BlockSpec((F, A), lambda b: (0, 0), **kw),
            pl.BlockSpec((Q, A), lambda b: (0, 0), **kw),
            pl.BlockSpec((1, A), lambda b: (0, 0), **kw),
            pl.BlockSpec((1, 1, A), lambda b: (0, 0, 0), **kw),
        ]
        return pl.pallas_call(
            kernel,
            out_shape=jax.ShapeDtypeStruct((Bp, F), out_dtype),
            grid_spec=pltpu.PrefetchScalarGridSpec(
                num_scalar_prefetch=0,
                grid=grid,
                in_specs=stream_specs + weight_specs,
                out_specs=pl.BlockSpec((block_b, F), lambda b: (b, 0)),
            ),
            compiler_params=pltpu.CompilerParams(
                dimension_semantics=("parallel",),
                vmem_limit_bytes=vmem_limit,
            ),
            cost_estimate=pl.CostEstimate(
                flops=int(flops),
                transcendentals=int(transcendentals),
                bytes_accessed=int(bytes_accessed),
            ),
        )(*inputs)

    try:
        out = _run(True)
    except Exception:
        # pl.Buffered(1) single-buffering of the broadcast weights is a pure
        # VMEM saving; fall back to default double-buffering if this
        # JAX/Mosaic build rejects it.
        out = _run(False)

    return out[:B] if Bp != B else out


# ---------------------------------------------------------------------------
# Pure-JAX reference & test
# ---------------------------------------------------------------------------
def reference_forward(feature, query, wf, wq, bq, wa, mask=None):
    fa = jnp.einsum("bnf,fa->bna", feature, wf)
    qa = query @ wq + bq
    a = jnp.einsum("bna,ao->bno", jnp.tanh(fa + qa[:, None, :]), wa)[..., 0]
    if mask is not None:
        a = jnp.where(mask == 0, -1e9, a)
    alpha = jax.nn.softmax(a, axis=1)
    return jnp.einsum("bn,bnf->bf", alpha, feature)


def xavier_uniform(key, fan_in, fan_out, gain, shape):
    bound = gain * math.sqrt(6.0 / (fan_in + fan_out))
    return jax.random.uniform(key, shape, jnp.float32, -bound, bound)


if __name__ == "__main__":
    # Small, module-consistent shapes.  B=16 -> block_b=8, 2 grid steps; N=8
    # exercises the candidate-axis padding (8 -> 16) in both masked/unmasked paths.
    B, N = 16, 8                   # batch, number of candidates
    FEAT, QDIM, ATT = 32, 16, 32   # feature_dim, query_dim, attention_dim

    key = jax.random.PRNGKey(0)
    k_f, k_q, k_wf, k_wq, k_wa = jax.random.split(key, 5)

    feature = jax.random.normal(k_f, (B, N, FEAT), jnp.float32)
    query = jax.random.normal(k_q, (B, QDIM), jnp.float32)

    # Deterministic "initialize()"-style parameters (xavier_uniform, tanh gain),
    # stored pre-transposed for right-multiplication inside the kernel.
    tanh_gain = 5.0 / 3.0
    wf = xavier_uniform(k_wf, FEAT, ATT, tanh_gain, (FEAT, ATT))   # feature_affine.weight^T
    wq = xavier_uniform(k_wq, QDIM, ATT, tanh_gain, (QDIM, ATT))   # query_affine.weight^T
    bq = jnp.zeros((ATT,), jnp.float32)                            # query_affine.bias
    wa = xavier_uniform(k_wa, ATT, 1, 1.0, (ATT, 1))               # attention_affine.weight^T

    mask = jnp.ones((B, N), jnp.int32).at[:, N - 2:].set(0)

    # The kernel uses bf16 MXU operands (and bf16 tanh / bf16 weighted products
    # on v6e/v7x); compare against the exact f32 reference evaluated on the same
    # bf16-quantized operands.  Remaining deltas: bf16 tanh rounding, bf16 final
    # products, f32 accumulation order and the approximate EUP reciprocal.
    fq = feature.astype(jnp.bfloat16).astype(jnp.float32)
    qq = query.astype(jnp.bfloat16).astype(jnp.float32)
    wfq = wf.astype(jnp.bfloat16).astype(jnp.float32)
    wqq = wq.astype(jnp.bfloat16).astype(jnp.float32)

    # Unmasked path (specialized kernel without a mask input; padded candidates
    # are handled by the static in-kernel iota mask).
    out = candidate_attention(feature, query, wf, wq, bq, wa, mask=None)
    out = jax.block_until_ready(out)
    ref = reference_forward(fq, qq, wfq, wqq, bq, wa, mask=None)
    assert out.shape == (B, FEAT)
    assert jnp.allclose(out, ref, atol=5e-2, rtol=5e-2), "unmasked mismatch vs reference"

    # Masked path.
    out_m = candidate_attention(feature, query, wf, wq, bq, wa, mask=mask)
    out_m = jax.block_until_ready(out_m)
    ref_m = reference_forward(fq, qq, wfq, wqq, bq, wa, mask=mask)
    assert jnp.allclose(out_m, ref_m, atol=5e-2, rtol=5e-2), "masked mismatch vs reference"

    print("KERNEL_OK")
</pallas_src>

<mosaic_0001>
module attributes {stable_mosaic.version = 11 : i64} {
  func.func @_candidate_attention_kernel(%arg0: i32, %arg1: memref<8x16x32xbf16, #tpu.memory_space<vmem>>, %arg2: memref<8x16xbf16, #tpu.memory_space<vmem>>, %arg3: memref<32x32xbf16, #tpu.memory_space<vmem>>, %arg4: memref<16x32xbf16, #tpu.memory_space<vmem>>, %arg5: memref<1x32xf32, #tpu.memory_space<vmem>>, %arg6: memref<1x1x32xf32, #tpu.memory_space<vmem>>, %arg7: memref<8x32xf32, #tpu.memory_space<vmem>>) attributes {dimension_semantics = [#tpu.dimension_semantics<parallel>], iteration_bounds = array<i64: 2>, scalar_prefetch = 0 : i64, scratch_operands = 0 : i64, tpu.core_type = #tpu.core_type<tc>, window_params = [{transform_indices = @transform_0, window_bounds = array<i64: 8, 16, 32>}, {transform_indices = @transform_1, window_bounds = array<i64: 8, 16>}, {pipeline_mode = #tpu.pipeline_mode<synchronous>, transform_indices = @transform_2, window_bounds = array<i64: 32, 32>}, {pipeline_mode = #tpu.pipeline_mode<synchronous>, transform_indices = @transform_3, window_bounds = array<i64: 16, 32>}, {pipeline_mode = #tpu.pipeline_mode<synchronous>, transform_indices = @transform_4, window_bounds = array<i64: 1, 32>}, {pipeline_mode = #tpu.pipeline_mode<synchronous>, transform_indices = @transform_5, window_bounds = array<i64: 1, 1, 32>}, {transform_indices = @transform_6, window_bounds = array<i64: 8, 32>}]} {
    %c0 = arith.constant 0 : index
    %c0_0 = arith.constant 0 : index
    %c0_1 = arith.constant 0 : index
    %0 = vector.load %arg1[%c0, %c0_0, %c0_1] : memref<8x16x32xbf16, #tpu.memory_space<vmem>>, vector<8x16x32xbf16>
    %1 = vector.shape_cast %0 : vector<8x16x32xbf16> to vector<128x32xbf16>
    %c0_2 = arith.constant 0 : index
    %c0_3 = arith.constant 0 : index
    %2 = vector.load %arg3[%c0_2, %c0_3] : memref<32x32xbf16, #tpu.memory_space<vmem>>, vector<32x32xbf16>
    %cst = arith.constant dense<0.000000e+00> : vector<128x32xf32>
    %3 = tpu.matmul %1, %2, %cst {dimension_numbers = #tpu.dot_dimension_numbers<[1], [0], [0], [1], [0, 0, 1, 1], [], []>} : vector<128x32xbf16>, vector<32x32xbf16>, vector<128x32xf32> -> vector<128x32xf32>
    %c0_4 = arith.constant 0 : index
    %c0_5 = arith.constant 0 : index
    %4 = vector.load %arg2[%c0_4, %c0_5] : memref<8x16xbf16, #tpu.memory_space<vmem>>, vector<8x16xbf16>
    %c0_6 = arith.constant 0 : index
    %c0_7 = arith.constant 0 : index
    %5 = vector.load %arg4[%c0_6, %c0_7] : memref<16x32xbf16, #tpu.memory_space<vmem>>, vector<16x32xbf16>
    %cst_8 = arith.constant dense<0.000000e+00> : vector<8x32xf32>
    %6 = tpu.matmul %4, %5, %cst_8 {dimension_numbers = #tpu.dot_dimension_numbers<[1], [0], [0], [1], [0, 0, 1, 1], [], []>} : vector<8x16xbf16>, vector<16x32xbf16>, vector<8x32xf32> -> vector<8x32xf32>
    %c0_9 = arith.constant 0 : index
    %c0_10 = arith.constant 0 : index
    %7 = vector.load %arg5[%c0_9, %c0_10] : memref<1x32xf32, #tpu.memory_space<vmem>>, vector<1x32xf32>
    %8 = vector.broadcast %7 : vector<1x32xf32> to vector<8x32xf32>
    %9 = arith.addf %6, %8 : vector<8x32xf32>
    %10 = vector.shape_cast %3 : vector<128x32xf32> to vector<8x16x32xf32>
    %11 = vector.shape_cast %9 : vector<8x32xf32> to vector<8x1x32xf32>
    %12 = vector.broadcast %11 : vector<8x1x32xf32> to vector<8x16x32xf32>
    %13 = arith.addf %10, %12 : vector<8x16x32xf32>
    %14 = arith.truncf %13 : vector<8x16x32xf32> to vector<8x16x32xbf16>
    %15 = math.tanh %14 : vector<8x16x32xbf16>
    %16 = arith.extf %15 : vector<8x16x32xbf16> to vector<8x16x32xf32>
    %c0_11 = arith.constant 0 : index
    %c0_12 = arith.constant 0 : index
    %c0_13 = arith.constant 0 : index
    %17 = vector.load %arg6[%c0_11, %c0_12, %c0_13] : memref<1x1x32xf32, #tpu.memory_space<vmem>>, vector<1x1x32xf32>
    %18 = vector.broadcast %17 : vector<1x1x32xf32> to vector<8x16x32xf32>
    %19 = arith.mulf %16, %18 : vector<8x16x32xf32>
    %cst_14 = arith.constant dense<0.000000e+00> : vector<8x16xf32>
    %20 = vector.multi_reduction <add>, %19, %cst_14 [2] : vector<8x16x32xf32> to vector<8x16xf32>
    %21 = vector.shape_cast %20 : vector<8x16xf32> to vector<8x16x1xf32>
    %22 = tpu.iota {dimensions = array<i32: 1>} : vector<8x16x1xi32>
    %c8_i32 = arith.constant 8 : i32
    %23 = vector.broadcast %c8_i32 : i32 to vector<8x16x1xi32>
    %24 = arith.cmpi slt, %22, %23 : vector<8x16x1xi32>
    %cst_15 = arith.constant -1.000000e+09 : f32
    %25 = vector.broadcast %cst_15 : f32 to vector<8x16x1xf32>
    %26 = arith.select %24, %21, %25 : vector<8x16x1xi1>, vector<8x16x1xf32>
    %cst_16 = arith.constant dense<0xFF800000> : vector<8x1xf32>
    %27 = vector.multi_reduction <maximumf>, %26, %cst_16 [1] : vector<8x16x1xf32> to vector<8x1xf32>
    %28 = vector.shape_cast %27 : vector<8x1xf32> to vector<8x1x1xf32>
    %29 = vector.broadcast %28 : vector<8x1x1xf32> to vector<8x16x1xf32>
    %30 = arith.subf %26, %29 : vector<8x16x1xf32>
    %31 = math.exp %30 : vector<8x16x1xf32>
    %cst_17 = arith.constant dense<0.000000e+00> : vector<8x1xf32>
    %32 = vector.multi_reduction <add>, %31, %cst_17 [1] : vector<8x16x1xf32> to vector<8x1xf32>
    %33 = vector.shape_cast %32 : vector<8x1xf32> to vector<8x1x1xf32>
    %34 = tpu.reciprocal %33 {approx = true} : vector<8x1x1xf32> -> vector<8x1x1xf32>
    %35 = vector.broadcast %34 : vector<8x1x1xf32> to vector<8x16x1xf32>
    %36 = arith.mulf %31, %35 : vector<8x16x1xf32>
    %37 = arith.truncf %36 : vector<8x16x1xf32> to vector<8x16x1xbf16>
    %38 = vector.broadcast %37 : vector<8x16x1xbf16> to vector<8x16x32xbf16>
    %39 = arith.mulf %0, %38 : vector<8x16x32xbf16>
    %40 = arith.extf %39 : vector<8x16x32xbf16> to vector<8x16x32xf32>
    %cst_18 = arith.constant dense<0.000000e+00> : vector<8x32xf32>
    %41 = vector.multi_reduction <add>, %40, %cst_18 [1] : vector<8x16x32xf32> to vector<8x32xf32>
    %c0_19 = arith.constant 0 : index
    %c0_20 = arith.constant 0 : index
    %42 = vector.load %arg7[%c0_19, %c0_20] : memref<8x32xf32, #tpu.memory_space<vmem>>, vector<8x32xf32>
    tpu.vector_store %arg7[%c0_19, %c0_20], %41 {strides = array<i32>} : memref<8x32xf32, #tpu.memory_space<vmem>>, vector<8x32xf32>,
    return
  }
  func.func @transform_0(%arg0: i32) -> (i32, i32, i32) {
    %c0_i32 = arith.constant 0 : i32
    %c0_i32_0 = arith.constant 0 : i32
    %c0_i32_1 = arith.constant 0 : i32
    return %arg0, %c0_i32, %c0_i32_0 : i32, i32, i32
  }
  func.func @transform_1(%arg0: i32) -> (i32, i32) {
    %c0_i32 = arith.constant 0 : i32
    %c0_i32_0 = arith.constant 0 : i32
    return %arg0, %c0_i32 : i32, i32
  }
  func.func @transform_2(%arg0: i32) -> (i32, i32) {
    %c0_i32 = arith.constant 0 : i32
    %c0_i32_0 = arith.constant 0 : i32
    %c0_i32_1 = arith.constant 0 : i32
    return %c0_i32, %c0_i32_0 : i32, i32
  }
  func.func @transform_3(%arg0: i32) -> (i32, i32) {
    %c0_i32 = arith.constant 0 : i32
    %c0_i32_0 = arith.constant 0 : i32
    %c0_i32_1 = arith.constant 0 : i32
    return %c0_i32, %c0_i32_0 : i32, i32
  }
  func.func @transform_4(%arg0: i32) -> (i32, i32) {
    %c0_i32 = arith.constant 0 : i32
    %c0_i32_0 = arith.constant 0 : i32
    %c0_i32_1 = arith.constant 0 : i32
    return %c0_i32, %c0_i32_0 : i32, i32
  }
  func.func @transform_5(%arg0: i32) -> (i32, i32, i32) {
    %c0_i32 = arith.constant 0 : i32
    %c0_i32_0 = arith.constant 0 : i32
    %c0_i32_1 = arith.constant 0 : i32
    %c0_i32_2 = arith.constant 0 : i32
    return %c0_i32, %c0_i32_0, %c0_i32_1 : i32, i32, i32
  }
  func.func @transform_6(%arg0: i32) -> (i32, i32) {
    %c0_i32 = arith.constant 0 : i32
    %c0_i32_0 = arith.constant 0 : i32
    return %arg0, %c0_i32 : i32, i32
  }
}

module attributes {stable_mosaic.version = 11 : i64} {
  func.func @_candidate_attention_kernel(%arg0: i32, %arg1: memref<8x16x32xbf16, #tpu.memory_space<vmem>>, %arg2: memref<8x16xbf16, #tpu.memory_space<vmem>>, %arg3: memref<32x32xbf16, #tpu.memory_space<vmem>>, %arg4: memref<16x32xbf16, #tpu.memory_space<vmem>>, %arg5: memref<1x32xf32, #tpu.memory_space<vmem>>, %arg6: memref<1x1x32xf32, #tpu.memory_space<vmem>>, %arg7: memref<8x32xf32, #tpu.memory_space<vmem>>) attributes {dimension_semantics = [#tpu.dimension_semantics<parallel>], iteration_bounds = array<i64: 2>, scalar_prefetch = 0 : i64, scratch_operands = 0 : i64, tpu.core_type = #tpu.core_type<tc>, window_params = [{transform_indices = @transform_0, window_bounds = array<i64: 8, 16, 32>}, {transform_indices = @transform_1, window_bounds = array<i64: 8, 16>}, {pipeline_mode = #tpu.pipeline_mode<synchronous>, transform_indices = @transform_2, window_bounds = array<i64: 32, 32>}, {pipeline_mode = #tpu.pipeline_mode<synchronous>, transform_indices = @transform_3, window_bounds = array<i64: 16, 32>}, {pipeline_mode = #tpu.pipeline_mode<synchronous>, transform_indices = @transform_4, window_bounds = array<i64: 1, 32>}, {pipeline_mode = #tpu.pipeline_mode<synchronous>, transform_indices = @transform_5, window_bounds = array<i64: 1, 1, 32>}, {transform_indices = @transform_6, window_bounds = array<i64: 8, 32>}]} {
    %c0 = arith.constant 0 : index
    %c0_0 = arith.constant 0 : index
    %c0_1 = arith.constant 0 : index
    %0 = vector.load %arg1[%c0, %c0_0, %c0_1] : memref<8x16x32xbf16, #tpu.memory_space<vmem>>, vector<8x16x32xbf16>
    %1 = vector.shape_cast %0 : vector<8x16x32xbf16> to vector<128x32xbf16>
    %c0_2 = arith.constant 0 : index
    %c0_3 = arith.constant 0 : index
    %2 = vector.load %arg3[%c0_2, %c0_3] : memref<32x32xbf16, #tpu.memory_space<vmem>>, vector<32x32xbf16>
    %cst = arith.constant dense<0.000000e+00> : vector<128x32xf32>
    %3 = tpu.matmul %1, %2, %cst {dimension_numbers = #tpu.dot_dimension_numbers<[1], [0], [0], [1], [0, 0, 1, 1], [], []>} : vector<128x32xbf16>, vector<32x32xbf16>, vector<128x32xf32> -> vector<128x32xf32>
    %c0_4 = arith.constant 0 : index
    %c0_5 = arith.constant 0 : index
    %4 = vector.load %arg2[%c0_4, %c0_5] : memref<8x16xbf16, #tpu.memory_space<vmem>>, vector<8x16xbf16>
    %c0_6 = arith.constant 0 : index
    %c0_7 = arith.constant 0 : index
    %5 = vector.load %arg4[%c0_6, %c0_7] : memref<16x32xbf16, #tpu.memory_space<vmem>>, vector<16x32xbf16>
    %cst_8 = arith.constant dense<0.000000e+00> : vector<8x32xf32>
    %6 = tpu.matmul %4, %5, %cst_8 {dimension_numbers = #tpu.dot_dimension_numbers<[1], [0], [0], [1], [0, 0, 1, 1], [], []>} : vector<8x16xbf16>, vector<16x32xbf16>, vector<8x32xf32> -> vector<8x32xf32>
    %c0_9 = arith.constant 0 : index
    %c0_10 = arith.constant 0 : index
    %7 = vector.load %arg5[%c0_9, %c0_10] : memref<1x32xf32, #tpu.memory_space<vmem>>, vector<1x32xf32>
    %8 = vector.broadcast %7 : vector<1x32xf32> to vector<8x32xf32>
    %9 = arith.addf %6, %8 : vector<8x32xf32>
    %10 = vector.shape_cast %3 : vector<128x32xf32> to vector<8x16x32xf32>
    %11 = vector.shape_cast %9 : vector<8x32xf32> to vector<8x1x32xf32>
    %12 = vector.broadcast %11 : vector<8x1x32xf32> to vector<8x16x32xf32>
    %13 = arith.addf %10, %12 : vector<8x16x32xf32>
    %14 = arith.truncf %13 : vector<8x16x32xf32> to vector<8x16x32xbf16>
    %15 = math.tanh %14 : vector<8x16x32xbf16>
    %16 = arith.extf %15 : vector<8x16x32xbf16> to vector<8x16x32xf32>
    %c0_11 = arith.constant 0 : index
    %c0_12 = arith.constant 0 : index
    %c0_13 = arith.constant 0 : index
    %17 = vector.load %arg6[%c0_11, %c0_12, %c0_13] : memref<1x1x32xf32, #tpu.memory_space<vmem>>, vector<1x1x32xf32>
    %18 = vector.broadcast %17 : vector<1x1x32xf32> to vector<8x16x32xf32>
    %19 = arith.mulf %16, %18 : vector<8x16x32xf32>
    %cst_14 = arith.constant dense<0.000000e+00> : vector<8x16xf32>
    %20 = vector.multi_reduction <add>, %19, %cst_14 [2] : vector<8x16x32xf32> to vector<8x16xf32>
    %21 = vector.shape_cast %20 : vector<8x16xf32> to vector<8x16x1xf32>
    %22 = tpu.iota {dimensions = array<i32: 1>} : vector<8x16x1xi32>
    %c8_i32 = arith.constant 8 : i32
    %23 = vector.broadcast %c8_i32 : i32 to vector<8x16x1xi32>
    %24 = arith.cmpi slt, %22, %23 : vector<8x16x1xi32>
    %cst_15 = arith.constant -1.000000e+09 : f32
    %25 = vector.broadcast %cst_15 : f32 to vector<8x16x1xf32>
    %26 = arith.select %24, %21, %25 : vector<8x16x1xi1>, vector<8x16x1xf32>
    %cst_16 = arith.constant dense<0xFF800000> : vector<8x1xf32>
    %27 = vector.multi_reduction <maximumf>, %26, %cst_16 [1] : vector<8x16x1xf32> to vector<8x1xf32>
    %28 = vector.shape_cast %27 : vector<8x1xf32> to vector<8x1x1xf32>
    %29 = vector.broadcast %28 : vector<8x1x1xf32> to vector<8x16x1xf32>
    %30 = arith.subf %26, %29 : vector<8x16x1xf32>
    %31 = math.exp %30 : vector<8x16x1xf32>
    %cst_17 = arith.constant dense<0.000000e+00> : vector<8x1xf32>
    %32 = vector.multi_reduction <add>, %31, %cst_17 [1] : vector<8x16x1xf32> to vector<8x1xf32>
    %33 = vector.shape_cast %32 : vector<8x1xf32> to vector<8x1x1xf32>
    %34 = tpu.reciprocal %33 {approx = true} : vector<8x1x1xf32> -> vector<8x1x1xf32>
    %35 = vector.broadcast %34 : vector<8x1x1xf32> to vector<8x16x1xf32>
    %36 = arith.mulf %31, %35 : vector<8x16x1xf32>
    %37 = arith.truncf %36 : vector<8x16x1xf32> to vector<8x16x1xbf16>
    %38 = vector.broadcast %37 : vector<8x16x1xbf16> to vector<8x16x32xbf16>
    %39 = arith.mulf %0, %38 : vector<8x16x32xbf16>
    %40 = arith.extf %39 : vector<8x16x32xbf16> to vector<8x16x32xf32>
    %cst_18 = arith.constant dense<0.000000e+00> : vector<8x32xf32>
    %41 = vector.multi_reduction <add>, %40, %cst_18 [1] : vector<8x16x32xf32> to vector<8x32xf32>
    %c0_19 = arith.constant 0 : index
    %c0_20 = arith.constant 0 : index
    %42 = vector.load %arg7[%c0_19, %c0_20] : memref<8x32xf32, #tpu.memory_space<vmem>>, vector<8x32xf32>
    tpu.vector_store %arg7[%c0_19, %c0_20], %41 {strides = array<i32>} : memref<8x32xf32, #tpu.memory_space<vmem>>, vector<8x32xf32>,
    return
  }
  func.func @transform_0(%arg0: i32) -> (i32, i32, i32) {
    %c0_i32 = arith.constant 0 : i32
    %c0_i32_0 = arith.constant 0 : i32
    %c0_i32_1 = arith.constant 0 : i32
    return %arg0, %c0_i32, %c0_i32_0 : i32, i32, i32
  }
  func.func @transform_1(%arg0: i32) -> (i32, i32) {
    %c0_i32 = arith.constant 0 : i32
    %c0_i32_0 = arith.constant 0 : i32
    return %arg0, %c0_i32 : i32, i32
  }
  func.func @transform_2(%arg0: i32) -> (i32, i32) {
    %c0_i32 = arith.constant 0 : i32
    %c0_i32_0 = arith.constant 0 : i32
    %c0_i32_1 = arith.constant 0 : i32
    return %c0_i32, %c0_i32_0 : i32, i32
  }
  func.func @transform_3(%arg0: i32) -> (i32, i32) {
    %c0_i32 = arith.constant 0 : i32
    %c0_i32_0 = arith.constant 0 : i32
    %c0_i32_1 = arith.constant 0 : i32
    return %c0_i32, %c0_i32_0 : i32, i32
  }
  func.func @transform_4(%arg0: i32) -> (i32, i32) {
    %c0_i32 = arith.constant 0 : i32
    %c0_i32_0 = arith.constant 0 : i32
    %c0_i32_1 = arith.constant 0 : i32
    return %c0_i32, %c0_i32_0 : i32, i32
  }
  func.func @transform_5(%arg0: i32) -> (i32, i32, i32) {
    %c0_i32 = arith.constant 0 : i32
    %c0_i32_0 = arith.constant 0 : i32
    %c0_i32_1 = arith.constant 0 : i32
    %c0_i32_2 = arith.constant 0 : i32
    return %c0_i32, %c0_i32_0, %c0_i32_1 : i32, i32, i32
  }
  func.func @transform_6(%arg0: i32) -> (i32, i32) {
    %c0_i32 = arith.constant 0 : i32
    %c0_i32_0 = arith.constant 0 : i32
    return %arg0, %c0_i32 : i32, i32
  }
}

</mosaic_0001>

<bundles_post_ra>
// kernel: tpu_custom_call.1
= control target key start
LH: loop header
LB: loop body
LE: loop exit
PB: predicated region body
PF: predicated region fallthrough
CT: control target
= control target key end

     0   :  { %s2581_s0 = inlined_call_operand.hbm [shape: bf16[16,16,32], index: 0, kind: input, shape index: {}]   ;;  %s2582_s1 = inlined_call_operand.hbm [shape: bf16[16,16], index: 1, kind: input, shape index: {}]   ;;  %s2583_s2 = inlined_call_operand.hbm [shape: bf16[32,32], index: 2, kind: input, shape index: {}]   ;;  %s2584_s3 = inlined_call_operand.hbm [shape: bf16[16,32], index: 3, kind: input, shape index: {}]   ;;  %s2585_s4 = inlined_call_operand.hbm [shape: f32[1,32], index: 4, kind: input, shape index: {}]   ;;  %s2586_s5 = inlined_call_operand.hbm [shape: f32[1,1,32], index: 5, kind: input, shape index: {}]   ;;  %s2587_s6 = inlined_call_operand.hbm [shape: f32[16,32], index: 6, kind: output, shape index: {}]  }
   0x1   :  { %2594 = sst [smem:[#allocation20_spill]] %s2581_s0 }
   0x2   :  { %2595 = sst [smem:[#allocation21_spill]] %s2583_s2 }
   0x3   :  { %2596 = sst [smem:[#allocation22_spill]] %s2584_s3 }
   0x4   :  { %2597 = sst [smem:[#allocation23_spill]] %s2585_s4 }
   0x5   :  { %11 = vsyncpa [#allocation3], 0 }
   0x6   :  { %13 = vsyncpa [#allocation3 + $0x1], 0 }
   0x7   :  { %14 = vsyncpa [#allocation6], 0 }
   0x8   :  { %16 = vsyncpa [#allocation6 + $0x1], 0 }
   0x9   :  { %17 = vsyncpa [#allocation9], 0 }
   0xa   :  { %18 = vsyncpa [#allocation12], 0 }
   0xb   :  { %19 = vsyncpa [#allocation4], 0 }
   0xc   :  { %21 = vsyncpa [#allocation4 + $0x1], 0  ;;  %s2019_s21 = smov 0   ;;  %s2021_s22 = smov 0  }
   0xd   :  { %s2023_s23 = smov 0   ;;  %s2025_s24 = smov 0  }
   0xe LB: > { %s2040_s25 = sadd.s32 4294967295, %s1968_s24   ;;  %s1449_s26 = sadd.s32 4294967294, %s1968_s24   ;;  %s1968_s24 = sphi %s2025_s24, %s2627_s24   ;;  %s1964_s23 = sphi %s2023_s23, %s2626_s23   ;;  %s1960_s22 = sphi %s2021_s22, %s2625_s22   ;;  %s1956_s21 = sphi %s2019_s21, %s2624_s21  }
   0xf   : > { %p47_p0 = scmp.ne.s32.totalorder %s1960_s22, %s1956_s21  ;;  %p2588_p1 = scmp.eq.s32.totalorder %s2040_s25, 0 }
  0x10   : > { %p187_p3 = scmp.eq.s32.totalorder %s1449_s26, 1  ;;  %p1450_p5 = scmp.ge.s32.totalorder %s1968_s24, 1 }
  0x11   : > { %p2049_p4 = por %p2588_p1, %p47_p0  ;;  %p194_p7 = scmp.lt.s32.totalorder %s1968_s24, 3 }
  0x12   : > { %p2054_p6 = por %p187_p3, %p47_p0  ;;  %s1970_s30 = smov [#allocation7]  }
  0x13   : > { %s2598_s27 = scalar_select %p2049_p4, 1, 0 }
  0x14   : > { %s2599_s28 = scalar_select %p2054_p6, 1, 0 }
  0x15   : > { %p2059_p8 = pnand %p1450_p5, %p194_p7  ;;  %s206_s7 = sshll.u32 %s1970_s30, 4  ;;  %s2063_s7 = int_to_ptr.vmem [resolvable:$true] %s206_s7 }
  0x16   : > { %s1971_s9 = smov [#allocation8]   ;;  %s1972_s11 = smov [#allocation10]  }
  0x17   : > { %s2600_s29 = scalar_select %p2059_p8, 1, 0 }
  0x18   : > { %p1562_p9 = pneg %p2059_p8  ;;  %s219_s10 = sshll.u32 %s1971_s9, 4  ;;  %s2074_s10 = int_to_ptr.vmem [resolvable:$true] %s219_s10 }
  0x19   : > { %s2076_s12 = sshll.u32 %s1972_s11, 4  ;;  %s2602_s2 = sld [smem:[#allocation21_spill]]  ;;  %s234_s12 = int_to_ptr.vmem [resolvable:$true] %s2076_s12 }
  0x1a   : > { %p2070_p11 = pnand %p1562_p9, %p2588_p1 }
  0x1c   : > { %p2086_p13 = pneg %p2070_p11 }
  0x1f   : > { %s1714_s15 = scalar_lea.hbm %s2602_s2, 256 }
  0x20   : > { %p1715_p12 = scmp.ne.s32.totalorder %s2602_s2, %s1714_s15  ;;  %p1721_p5 = scmp.lt.u32.totalorder %s1714_s15, %s2602_s2 }
  0x22   : > { %p1717_p0 = pnand %p2086_p13, %p1715_p12 }
  0x24   : > { %p1718_p3 = pneg %p1717_p0 }
  0x26   : > { %p1723_p7 = pnand %p1721_p5, %p1718_p3 }
  0x28   : > { %1726 = shalt.err (!%p1723_p7)
}
  0x29   : > { %s1727_s26 = scalar_lea.vmem %s2063_s7, 256  ;;  %p1735_p2 = scmp.lt.s32.totalorder %s2063_s7, %s2063_s7 }
  0x2a   : > { %p1728_p9 = scmp.ne.s32.totalorder %s2063_s7, %s1727_s26  ;;  %p1736_p6 = scmp.lt.s32.totalorder %s1727_s26, %s1727_s26 }
  0x2c   : > { %p1730_p10 = pnand %p1728_p9, %p2086_p13  ;;  %p1737_p12 = por %p1736_p6, %p1735_p2 }
  0x2e   : > { %p1731_p1 = pneg %p1730_p10 }
  0x30   : > { %p1738_p0 = pnand %p1737_p12, %p1731_p1 }
  0x32   : > { %1741 = shalt.err (!%p1738_p0)
}
  0x33   : > { %s2591_s30 = smov 64   ;;  %s2592_s9 = smov 4  }
  0x34   : > { %1565 = dma.hbm_to_vmem [thread:$0]  (!%p2070_p11), %s2602_s2, 256, %s2063_s7, [#allocation6], %s2591_s30, %s2591_s30, %s2592_s9  }
  0x35   : > { %s2604_s3 = sld [smem:[#allocation22_spill]] }
  0x3b   : > { %s1742_s16 = scalar_lea.hbm %s2604_s3, 128 }
  0x3c   : > { %p1743_p1 = scmp.ne.s32.totalorder %s2604_s3, %s1742_s16  ;;  %p1749_p10 = scmp.lt.u32.totalorder %s1742_s16, %s2604_s3 }
  0x3e   : > { %p1745_p2 = pnand %p1743_p1, %p2086_p13 }
  0x40   : > { %p1746_p6 = pneg %p1745_p2 }
  0x42   : > { %p1751_p3 = pnand %p1749_p10, %p1746_p6 }
  0x44   : > { %1754 = shalt.err (!%p1751_p3)
}
  0x45   : > { %s1755_s7 = scalar_lea.vmem %s2074_s10, 128  ;;  %p1763_p12 = scmp.lt.s32.totalorder %s2074_s10, %s2074_s10 }
  0x46   : > { %p1756_p5 = scmp.ne.s32.totalorder %s2074_s10, %s1755_s7  ;;  %p1764_p0 = scmp.lt.s32.totalorder %s1755_s7, %s1755_s7 }
  0x48   : > { %p1758_p7 = pnand %p1756_p5, %p2086_p13  ;;  %p1765_p1 = por %p1764_p0, %p1763_p12 }
  0x4a   : > { %p1759_p9 = pneg %p1758_p7 }
  0x4c   : > { %p1766_p2 = pnand %p1765_p1, %p1759_p9 }
  0x4e   : > { %1769 = shalt.err (!%p1766_p2)
}
  0x4f   : > { %1568 = dma.hbm_to_vmem [thread:$0]  (!%p2070_p11), %s2604_s3, 128, %s2074_s10, [#allocation9], %s2591_s30, %s2591_s30, %s2592_s9  }
  0x50   : > { %s2605_s4 = sld [smem:[#allocation23_spill]] }
  0x56   : > { %s1770_s16 = scalar_lea.hbm %s2605_s4, 16 }
  0x57   : > { %p1771_p6 = scmp.ne.s32.totalorder %s2605_s4, %s1770_s16  ;;  %p1777_p5 = scmp.lt.u32.totalorder %s1770_s16, %s2605_s4 }
  0x59   : > { %p1773_p10 = pnand %p1771_p6, %p2086_p13 }
  0x5b   : > { %p1774_p3 = pneg %p1773_p10 }
  0x5d   : > { %p1779_p7 = pnand %p1777_p5, %p1774_p3 }
  0x5f   : > { %1782 = shalt.err (!%p1779_p7)
}
  0x60   : > { %s1783_s7 = scalar_lea.vmem %s234_s12, 16  ;;  %s1790_s10 = scalar_lea.vmem %s234_s12, 32 }
  0x61   : > { %p1784_p9 = scmp.ne.s32.totalorder %s234_s12, %s1783_s7  ;;  %p1791_p1 = scmp.lt.s32.totalorder %s234_s12, %s234_s12 }
  0x62   : > { %p1792_p2 = scmp.lt.s32.totalorder %s1790_s10, %s1783_s7 }
  0x63   : > { %p1786_p12 = pnand %p1784_p9, %p2086_p13 }
  0x64   : > { %p1793_p4 = por %p1792_p2, %p1791_p1 }
  0x65   : > { %p1787_p0 = pneg %p1786_p12 }
  0x67   : > { %p1794_p8 = pnand %p1793_p4, %p1787_p0 }
  0x69   : > { %1797 = shalt.err (!%p1794_p8)
}
  0x6a   : > { %1571 = dma.hbm_to_vmem [thread:$0]  (!%p2070_p11), %s2605_s4, 16, %s234_s12, [#allocation9]  }
  0x6b   : > { %s1975_s14 = smov [#allocation11]   ;;  %s1798_s19 = scalar_lea.hbm %s2586_s5, 16 }
  0x6c   : > { %s244_s15 = sshll.u32 %s1975_s14, 4  ;;  %p1799_p6 = scmp.ne.s32.totalorder %s2586_s5, %s1798_s19  ;;  %s245_s15 = int_to_ptr.vmem [resolvable:$true] %s244_s15 }
  0x6d   : > { %p1805_p10 = scmp.lt.u32.totalorder %s1798_s19, %s2586_s5 }
  0x6e   : > { %p1801_p4 = pnand %p1799_p6, %p2086_p13 }
  0x70   : > { %p1802_p8 = pneg %p1801_p4 }
  0x72   : > { %p1807_p3 = pnand %p1805_p10, %p1802_p8 }
  0x74   : > { %1810 = shalt.err (!%p1807_p3)
}
  0x75   : > { %s1811_s12 = scalar_lea.vmem %s245_s15, 16  ;;  %s1818_s11 = scalar_lea.vmem %s245_s15, 32 }
  0x76   : > { %p1812_p5 = scmp.ne.s32.totalorder %s245_s15, %s1811_s12  ;;  %p1819_p12 = scmp.lt.s32.totalorder %s245_s15, %s245_s15 }
  0x77   : > { %p1820_p0 = scmp.lt.s32.totalorder %s1818_s11, %s1811_s12 }
  0x78   : > { %p1814_p7 = pnand %p1812_p5, %p2086_p13 }
  0x79   : > { %p1821_p1 = por %p1820_p0, %p1819_p12 }
  0x7a   : > { %p1815_p9 = pneg %p1814_p7 }
  0x7c   : > { %p1822_p2 = pnand %p1821_p1, %p1815_p9 }
  0x7e   : > { %1825 = shalt.err (!%p1822_p2)
}
  0x7f   : > { %1574 = dma.hbm_to_vmem [thread:$0]  (!%p2070_p11), %s2586_s5, 16, %s245_s15, [#allocation12]  }
  0x80   : > { %s2174_s18 = sadd.s32 1, %s1968_s24   ;;  %s34_s16 = sadd.s32 1, %s1964_s23 }
  0x81   : > { %s31_s8 = ssub.s32 %s1968_s24, %s2174_s18  ;;  %p41_p13 = scmp.ne.s32.totalorder %s1964_s23, %s1960_s22 }
  0x82   : > { %p32_p6 = scmp.eq.s32.totalorder %s31_s8, 0  ;;  %p42_p4 = scmp.eq.s32.totalorder %s1968_s24, 0 }
  0x83   : > { %p2606_p8 = scmp.eq.s32.totalorder %s2040_s25, 1  ;;  %p1590_p3 = scmp.lt.s32.totalorder %s1968_s24, 2 }
  0x84   : > { %s2190_s19 = scalar_select %p32_p6, %s1964_s23, %s34_s16  }
  0x85   : > { %p2184_p10 = por %p2606_p8, %p41_p13  ;;  %p43_p5 = por %p42_p4, %p41_p13 }
  0x86   : > { %s2193_s20 = sand.u32 1, %s1964_s23   ;;  %s1497_s26 = sshll.u32 %s1968_s24, 10 }
  0x87   : > { %s2607_s17 = scalar_select %p2184_p10, 1, 0 }
  0x88   : > { %s1456_s15 = sshll.u32 %s2193_s20, 6  ;;  %s2608_s0 = sld [smem:[#allocation20_spill]] }
  0x89   : > { %s259_s11 = scalar_lea.vmem [#allocation2], %s1456_s15  ;;  %p2204_p11 = pnand %p1590_p3, %p43_p5 }
  0x8a   : > { %s267_s13 = sshll.u32 %s259_s11, 4  ;;  %s1460_s8 = sshll.u32 %s2193_s20, 2  ;;  %s2202_s13 = int_to_ptr.vmem [resolvable:$true] %s267_s13 }
  0x8b   : > { %s256_s30 = scalar_lea.sflag [#allocation3], %s2193_s20  ;;  %p1828_p9 = pneg %p2204_p11 }
  0x8e   : > { %s2200_s12 = scalar_lea.hbm %s2608_s0, %s1497_s26  ;;  %s1831_s10 = scalar_lea.hbm %s2608_s0, 2048 }
  0x8f   : > { %s1826_s7 = scalar_lea.hbm %s2200_s12, 1024  ;;  %p1832_p1 = scmp.lt.u32.totalorder %s2200_s12, %s2608_s0 }
  0x90   : > { %p1827_p7 = scmp.ne.s32.totalorder %s2200_s12, %s1826_s7  ;;  %p1833_p2 = scmp.lt.u32.totalorder %s1831_s10, %s1826_s7 }
  0x91   : > { %p1835_p6 = scmp.lt.u32.totalorder %s1826_s7, %s2200_s12 }
  0x92   : > { %p1829_p12 = pnand %p1828_p9, %p1827_p7  ;;  %p1834_p13 = por %p1833_p2, %p1832_p1 }
  0x94   : > { %p1830_p0 = pneg %p1829_p12  ;;  %p1836_p4 = por %p1835_p6, %p1834_p13 }
  0x96   : > { %p1837_p8 = pnand %p1836_p4, %p1830_p0 }
  0x98   : > { %1840 = shalt.err (!%p1837_p8)
}
  0x99   : > { %s1841_s16 = scalar_lea.vmem %s2202_s13, 1024  ;;  %s1976_s15 = smov [#allocation2]  }
  0x9a   : > { %p1842_p3 = scmp.ne.s32.totalorder %s2202_s13, %s1841_s16  ;;  %s1846_s26 = sshll.u32 %s1976_s15, 4  ;;  %s1847_s26 = int_to_ptr.vmem [resolvable:$false] %s1846_s26 }
  0x9b   : > { %s1848_s9 = scalar_lea.vmem %s1847_s26, 2048  ;;  %p1849_p12 = scmp.lt.s32.totalorder %s2202_s13, %s1847_s26 }
  0x9c   : > { %p1844_p5 = pnand %p1842_p3, %p1828_p9  ;;  %p1850_p1 = scmp.lt.s32.totalorder %s1848_s9, %s1841_s16 }
  0x9e   : > { %p1845_p7 = pneg %p1844_p5  ;;  %p1851_p2 = por %p1850_p1, %p1849_p12 }
  0xa0   : > { %p1852_p13 = pnand %p1851_p2, %p1845_p7 }
  0xa2   : > { %1855 = shalt.err (!%p1852_p13)
}
  0xa3   : > { %s2610_s7 = smov 4   ;;  %s2611_s10 = smov 64  }
  0xa4   : > { %1578 = dma.hbm_to_vmem [thread:$0]  (!%p2204_p11), %s2200_s12, 1024, %s2202_s13, %s256_s30, %s2611_s10, %s2611_s10, %s2610_s7  }
  0xa5   : > { %s1461_s11 = sshll.u32 %s1968_s24, 6  ;;  %s281_s9 = scalar_lea.vmem [#allocation5], %s1460_s8 }
  0xa6   : > { %s2245_s26 = scalar_lea.hbm %s2582_s1, %s1461_s11  ;;  %s288_s0 = sshll.u32 %s281_s9, 4  ;;  %s289_s0 = int_to_ptr.vmem [resolvable:$true] %s288_s0 }
  0xa7   : > { %s2612_s2 = sand.u32 1, %s1968_s24   ;;  %s1856_s4 = scalar_lea.hbm %s2245_s26, 64 }
  0xa8   : > { %s278_s3 = scalar_lea.sflag [#allocation6], %s2612_s2  ;;  %p1857_p0 = scmp.ne.s32.totalorder %s2245_s26, %s1856_s4 }
  0xa9   : > { %s1861_s13 = scalar_lea.hbm %s2582_s1, 128  ;;  %p1862_p8 = scmp.lt.u32.totalorder %s2245_s26, %s2582_s1 }
  0xaa   : > { %p1859_p6 = pnand %p1857_p0, %p1828_p9  ;;  %p1863_p3 = scmp.lt.u32.totalorder %s1861_s13, %s1856_s4 }
  0xab   : > { %p1865_p7 = scmp.lt.u32.totalorder %s1856_s4, %s2245_s26 }
  0xac   : > { %p1860_p4 = pneg %p1859_p6  ;;  %p1864_p5 = por %p1863_p3, %p1862_p8 }
  0xae   : > { %p1866_p12 = por %p1865_p7, %p1864_p5 }
  0xb0   : > { %p1867_p1 = pnand %p1866_p12, %p1860_p4 }
  0xb2   : > { %1870 = shalt.err (!%p1867_p1)
}
  0xb3   : > { %s1871_s2 = scalar_lea.vmem %s289_s0, 64  ;;  %s1977_s8 = smov [#allocation5]  }
  0xb4   : > { %p1872_p2 = scmp.ne.s32.totalorder %s289_s0, %s1871_s2  ;;  %s1876_s10 = sshll.u32 %s1977_s8, 4  ;;  %s1877_s10 = int_to_ptr.vmem [resolvable:$false] %s1876_s10 }
  0xb5   : > { %s1878_s11 = scalar_lea.vmem %s1877_s10, 128  ;;  %p1879_p6 = scmp.lt.s32.totalorder %s289_s0, %s1877_s10 }
  0xb6   : > { %p1874_p13 = pnand %p1872_p2, %p1828_p9  ;;  %p1880_p10 = scmp.lt.s32.totalorder %s1878_s11, %s1871_s2 }
  0xb8   : > { %p1875_p0 = pneg %p1874_p13  ;;  %p1881_p3 = por %p1880_p10, %p1879_p6 }
  0xba   : > { %p1882_p8 = pnand %p1881_p3, %p1875_p0 }
  0xbc   : > { %1885 = shalt.err (!%p1882_p8)
}
  0xbd   : > { %1581 = dma.hbm_to_vmem [thread:$0]  (!%p2204_p11), %s2245_s26, 64, %s289_s0, %s278_s3  }
  0xbe   : > { %p2613_p4 = scmp.ne.s32.totalorder %s2600_s29, 0 }
  0xbf   : > { %s2273_s4 = sand.u32 (!%p2613_p4), 1, %s1960_s22   ;;  %p2614_p10 = scmp.ne.s32.totalorder (!%p2613_p4), %s2598_s27, 0 }
  0xc0   : > { %297 = sbr.rel (%p2613_p4) target bundleno = 744 (0x2e8), region = 44  ;;  %s1463_s15 = sshll.u32 (!%p2613_p4), %s2273_s4, 6 }
  0xc1   : > { %s300_s16 = scalar_lea.sflag (!%p2613_p4), [#allocation3], %s2273_s4  ;;  %s2277_s9 = scalar_lea.vmem (!%p2613_p4), [#allocation2], %s1463_s15 }
  0xc7   : > { %1931 = dma.done.wait (%p2614_p10), %s300_s16, 1024  }
  0xc8   : > { %1933 = vsyncadd (%p2614_p10), %s300_s16, 4294966272  ;;  %s308_s0 = sand.u32 1, %s2040_s25   ;;  %s1464_s3 = sshll.u32 %s2273_s4, 2 }
  0xc9   : > { %s309_s29 = scalar_lea.sflag [#allocation6], %s308_s0  ;;  %s2285_s14 = scalar_lea.vmem [#allocation5], %s1464_s3 }
  0xca   : > { %1935 = dma.done.wait (%p2614_p10), %s309_s29, 64  }
  0xcb   : > { %1937 = vsyncadd (%p2614_p10), %s309_s29, 4294967232  ;;  %p2615_p11 = scmp.eq.s32.totalorder %s2040_s25, 0 }
  0xcd   : > { %1939 = dma.done.wait (%p2615_p11), [#allocation6], 256   ;;  %p2616_p9 = pmov %p2615_p11 }
  0xcf   : > { %1941 = vsyncadd (%p2616_p9), [#allocation6], 4294967040  ;;  %p2617_p5 = pmov %p2616_p9 }
  0xd1   : > { %1943 = dma.done.wait (%p2617_p5), [#allocation9], 144   ;;  %p2618_p7 = pmov %p2617_p5 }
  0xd2   : > { %p2619_p12 = pmov %p2617_p5 }
  0xd3   : > { %1945 = vsyncadd (%p2618_p7), [#allocation9], 4294967152 }
  0xd4   : > { %1947 = dma.done.wait (%p2619_p12), [#allocation12], 16   ;;  %p2620_p1 = pmov %p2617_p5 }
  0xd5   : > { %v1639_v0 = vld [vmem:[#allocation7] sm:$0xff]   ;;  %v1640_v1 = vld [vmem:[#allocation7 + $0x8] sm:$0xff]   ;;  %vm436_vm0 = vcmask 261120   ;;  %v2304_v2 = vld [vmem:[%s2277_s9] sm:$0xf]  ;;  %v1978_v18 = vmov 0.0   ;;  %v623_v31 = vlaneseq }
  0xd6   : > { %1949 = vsyncadd (%p2620_p1), [#allocation12], 4294967280  ;;  %1510 = vmatprep.subr.bf16.mxu0 %v1639_v0  ;;  %1536 = vmatprep.subr.bf16.mxu1 %v1639_v0  ;;  %v2307_v3 = vld [vmem:[%s2277_s9 + $0x4] sm:$0xf]  ;;  %v2310_v4 = vld [vmem:[%s2277_s9 + $0x30] sm:$0xf] }
  0xd7   : > { %1511 = vmatpush3.bf16.msra.mxu0 %v1639_v0  ;;  %1538 = vmatpush3.bf16.msra.mxu1 %v1639_v0  ;;  %v1470_v5 = vcombine.low %v2304_v2, %v2307_v3  ;;  %v2315_v6 = vld [vmem:[%s2277_s9 + $0x34] sm:$0xf]  ;;  %v2318_v7 = vld [vmem:[%s2277_s9 + $0x8] sm:$0xf]  ;;  %v2321_v8 = vld [vmem:[%s2277_s9 + $0xc] sm:$0xf] }
  0xd8   : > { %1512 = vmatprep.subr.bf16.mxu0 %v1640_v1  ;;  %1537 = vmatprep.subr.bf16.mxu1 %v1640_v1  ;;  %v1476_v9 = vcombine.low %v2310_v4, %v2315_v6  ;;  %v2326_v10 = vld [vmem:[%s2277_s9 + $0x38] sm:$0xf]  ;;  %v2329_v11 = vld [vmem:[%s2277_s9 + $0x3c] sm:$0xf]  ;;  %v2333_v12 = vld [vmem:[%s2277_s9 + $0x10] sm:$0xf]  ;;  %v1471_v13 = vcombine.low %v2318_v7, %v2321_v8 }
  0xd9   : > { %1514 = vmatprep.mubr.msk.bf16.mxu0 %vm436_vm0, %v1470_v5  ;;  %v1477_v14 = vcombine.low %v2326_v10, %v2329_v11  ;;  %v2341_v15 = vld [vmem:[%s2277_s9 + $0x14] sm:$0xf]  ;;  %v1645_v16 = vld [vmem:[#allocation8] sm:$0xff]   ;;  %vm1979_vm1 = vmmov 0   ;;  %v2355_v21 = vld [vmem:[%s2277_s9 + $0x20] sm:$0xf] }
  0xda   : > { %1526 = vmatprep.mubr.msk.bf16.mxu1 %vm436_vm0, %v1476_v9  ;;  %v1472_v17 = vcombine.low %v2333_v12, %v2341_v15  ;;  %v2349_v19 = vld [vmem:[%s2277_s9 + $0x18] sm:$0xf]  ;;  %v2352_v20 = vld [vmem:[%s2277_s9 + $0x1c] sm:$0xf]  ;;  %v2358_v22 = vld [vmem:[%s2277_s9 + $0x24] sm:$0xf] }
  0xdb   : > { %1513 = vmatpush3.bf16.msra.mxu0 %v1640_v1  ;;  %1539 = vmatpush3.bf16.msra.mxu1 %v1640_v1  ;;  %v1473_v23 = vcombine.low %v2349_v19, %v2352_v20  ;;  %v558_v24 = vld [vmem:[%s2285_s14] sm:$0xf]  ;;  %vm574_vm2 = vcmask 130048   ;;  %v1474_v25 = vcombine.low %v2355_v21, %v2358_v22  ;;  %v2368_v26 = vld [vmem:[%s2277_s9 + $0x28] sm:$0xf]  ;;  %v2382_v41 = vshrl.u32 %v623_v31, 7 }
  0xdc   : > { %1530 = vmatprep.subr.bf16.mxu1 %v1978_v18  ;;  %v2371_v27 = vld [vmem:[%s2277_s9 + $0x2c] sm:$0xf]  ;;  %v1980_v29 = vmov 1966171168   ;;  %v1488_v42 = vld [vmem:[#allocation10] ss:$0 sm:$0xff] }
  0xdd   : > { %v1475_v28 = vcombine.low %v2368_v26, %v2371_v27  ;;  %v621_v30 = vunpack.c.l.s4 %v1980_v29  ;;  %v670_v53 = vsub.s32 0, %v2382_v41  ;;  %vm1288_vm3 = vcmask 1041409   ;;  %s1469_s27 = sshll.u32 %s2273_s4, 3  ;;  %s1493_s26 = sshll.u32 %s2040_s25, 7 }
  0xde   : > { %1515 = vmatmul.mubr.msk.bf16.vlgmr.msra.gmra.mrb[0].mxu0 %vm436_vm0, %v1471_v13  ;;  %1527 = vmatmul.mubr.msk.bf16.vlgmr.msra.gmra.mrb[0].mxu1 %vm436_vm0, %v1477_v14  ;;  %vm1290_vm4 = vcmask 1042434   ;;  %vm1292_vm5 = vcmask 1043459   ;;  %vm1294_vm6 = vcmask 1044484   ;;  %vm1296_vm7 = vcmask 1045509   ;;  %s361_s30 = scalar_lea.vmem [#allocation13], %s1469_s27  ;;  %s2536_s7 = scalar_lea.hbm %s2587_s6, %s1493_s26 }
  0xdf   : > { %1531 = vmatpush3.bf16.msra.mxu1 %v1645_v16  ;;  %1518 = vmatprep.mubr.msk.bf16.mxu0 %vm436_vm0, %v1472_v17  ;;  %v622_v40 = vunpack.c.0.s8 %v621_v30  ;;  %vm1298_vm8 = vcmask 1046534   ;;  %s1318_s12 = sshll.u32 %s361_s30, 4  ;;  %vm1300_vm9 = vcmask 1047559   ;;  %s1305_s2 = scalar_lea.sflag [#allocation4], %s2273_s4  ;;  %s2538_s12 = int_to_ptr.vmem [resolvable:$true] %s1318_s12 }
  0xe0   : > { %1532 = vmatprep.mubr.msk.bf16.mxu1 %vm1979_vm1, %v1978_v18  ;;  %s1886_s25 = scalar_lea.vmem %s2538_s12, 128  ;;  %p2621_p13 = scmp.ne.s32.totalorder %s2607_s17, 0 }
  0xe1   : > { %v625_v43 = vsub.s32 %v622_v40, %v2382_v41  ;;  %p1887_p2 = scmp.ne.s32.totalorder %s2538_s12, %s1886_s25  ;;  %s1983_s8 = smov [#allocation13]  }
  0xe2   : > { %s1890_s10 = sshll.u32 %s1983_s8, 4  ;;  %s1891_s10 = int_to_ptr.vmem [resolvable:$false] %s1890_s10 }
  0xe3   : > { %p1888_p0 = pnand %p1887_p2, %p2621_p13  ;;  %s1892_s11 = scalar_lea.vmem %s1891_s10, 256 }
  0xe4   : > { %p1893_p3 = scmp.lt.s32.totalorder %s2538_s12, %s1891_s10  ;;  %p1894_p8 = scmp.lt.s32.totalorder %s1892_s11, %s1886_s25 }
  0xe5   : > { %p1889_p6 = pneg %p1888_p0 }
  0xe6   : > { %1519 = vmatmul.mubr.msk.bf16.gmra.mrb[4].mxu0 %vm436_vm0, %v1473_v23  ;;  %1533 = vmatmul.mubr.msk.bf16.vlgmr.msra.gmra.mrb[4].mxu1 %vm574_vm2, %v558_v24  ;;  %p1895_p4 = por %p1894_p8, %p1893_p3 }
  0xe7   : > { %1522 = vmatprep.mubr.msk.bf16.mxu0 %vm436_vm0, %v1474_v25 }
  0xe8   : > { %p1896_p10 = pnand %p1895_p4, %p1889_p6 }
  0xee   : > { %1523 = vmatmul.mubr.msk.bf16.gmra.mrb[8].mxu0 %vm436_vm0, %v1475_v28 }
 0x1b1   : > { %v2376_v32 = vpop.f32.mrb[0].mxu1  ;;  %v1516_v33 = vpop.f32.mrb[0].mxu0 }
 0x1b2   : > { %v2378_v34 = vpop.f32.mrb[1].mxu1  ;;  %v495_v35 = vpop.f32.mrb[1].mxu0 }
 0x1b3   : > { %v2380_v36 = vpop.f32.mrb[2].mxu1  ;;  %v1517_v37 = vpop.f32.mrb[2].mxu0 }
 0x1b4   : > { %v546_v38 = vpop.f32.mrb[3].mxu1  ;;  %v498_v39 = vpop.f32.mrb[3].mxu0 }
 0x1b9   : > { %v612_v44 = vpop.f32.mrb[4].mxu1  ;;  %v1520_v45 = vpop.f32.mrb[4].mxu0 }
 0x1ba   : > { %v613_v46 = vadd.f32 %v1488_v42, %v612_v44  ;;  %v1534_v47 = vpop.f32.mrb[5].mxu1  ;;  %v511_v48 = vpop.f32.mrb[5].mxu0 }
 0x1bb   : > { %v615_v49 = vpop.f32.mrb[6].mxu1  ;;  %v1521_v50 = vpop.f32.mrb[6].mxu0 }
 0x1bc   : > { %v619_v51 = vcombine.high %v613_v46, %v613_v46  ;;  %v626_v52 = vrot.slane %v613_v46, %v625_v43  ;;  %v1535_v54 = vpop.f32.mrb[7].mxu1  ;;  %v514_v55 = vpop.f32.mrb[7].mxu0 }
 0x1be   : > { %v633_v56 = vrot.slane %v619_v51, %v625_v43  ;;  %v634_v57 = vcombine.high %v626_v52, %v626_v52  ;;  %v642_v58 = vrot.slane %v626_v52, %v625_v43 }
 0x1c0   : > { %v671_v59 = vrot.slane %v642_v58, %v670_v53  ;;  %v656_v60 = vrot.slane %v634_v57, %v625_v43  ;;  %v664_v61 = vcombine.high %v642_v58, %v642_v58  ;;  %v635_v62 = vcombine.high %v633_v56, %v633_v56 }
 0x1c1   : > { %v1524_v63 = vpop.f32.mrb[8].mxu0  ;;  %v649_v0 = vrot.slane %v633_v56, %v625_v43 }
 0x1c2   : > { %v708_v1 = vadd.f32 %v671_v59, %v495_v35  ;;  %v709_v5 = vadd.f32 %v671_v59, %v498_v39  ;;  %v666_v9 = vcombine.high %v656_v60, %v656_v60  ;;  %v675_v13 = vrot.slane %v656_v60, %v670_v53  ;;  %v527_v14 = vpop.f32.mrb[9].mxu0 }
 0x1c3   : > { %v679_v16 = vrot.slane %v664_v61, %v670_v53  ;;  %v663_v17 = vrot.slane %v635_v62, %v625_v43  ;;  %v665_v18 = vcombine.high %v649_v0, %v649_v0  ;;  %v687_v23 = vrot.slane %v649_v0, %v670_v53  ;;  %v1525_v24 = vpop.f32.mrb[10].mxu0  ;;  %v1491_v61 = vld [vmem:[#allocation11] ss:$0 sm:$0xff] }
 0x1c4   : > { %v683_v25 = vrot.slane %v666_v9, %v670_v53  ;;  %v530_v28 = vpop.f32.mrb[11].mxu0  ;;  %v724_v29 = vpack.c.bf16 %v709_v5, %v708_v1  ;;  %v710_v30 = vadd.f32 %v1516_v33, %v675_v13  ;;  %v711_v31 = vadd.f32 %v1517_v37, %v675_v13 }
 0x1c5   : > { %v712_v40 = vadd.f32 %v679_v16, %v511_v48  ;;  %v713_v42 = vadd.f32 %v679_v16, %v514_v55  ;;  %v667_v44 = vcombine.high %v663_v17, %v663_v17  ;;  %v691_v46 = vrot.slane %v663_v17, %v670_v53 }
 0x1c6   : > { %v714_v47 = vadd.f32 %v1520_v45, %v683_v25  ;;  %v715_v35 = vadd.f32 %v1521_v50, %v683_v25  ;;  %v695_v39 = vrot.slane %v665_v18, %v670_v53  ;;  %v716_v49 = vadd.f32 %v687_v23, %v527_v14 }
 0x1c7   : > { %v726_v51 = vpack.c.bf16 %v713_v42, %v712_v40  ;;  %v699_v52 = vrot.slane %v667_v44, %v670_v53  ;;  %v718_v54 = vadd.f32 %v1524_v63, %v691_v46  ;;  %v719_v43 = vadd.f32 %v1525_v24, %v691_v46 }
 0x1c8   : > { %v727_v56 = vpack.c.bf16 %v715_v35, %v714_v47  ;;  %v717_v57 = vadd.f32 %v687_v23, %v530_v28  ;;  %1650 = vtanh.bf16 %v724_v29  ;;  %v725_v58 = vpack.c.bf16 %v711_v31, %v710_v30 }
 0x1c9   : > { %1652 = vtanh.bf16 %v726_v51  ;;  %v729_v59 = vpack.c.bf16 %v719_v43, %v718_v54  ;;  %v720_v33 = vadd.f32 %v695_v39, %v2378_v34  ;;  %v721_v37 = vadd.f32 %v695_v39, %v546_v38 }
 0x1ca   : > { %1654 = vtanh.bf16 %v727_v56  ;;  %v728_v48 = vpack.c.bf16 %v717_v57, %v716_v49  ;;  %v722_v45 = vadd.f32 %v2376_v32, %v699_v52  ;;  %v723_v50 = vadd.f32 %v2380_v36, %v699_v52 }
 0x1cb   : > { %1656 = vtanh.bf16 %v729_v59  ;;  %v730_v55 = vpack.c.bf16 %v721_v37, %v720_v33 }
 0x1cc   : > { %1658 = vtanh.bf16 %v728_v48  ;;  %v731_v53 = vpack.c.bf16 %v723_v50, %v722_v45 }
 0x1cd   : > { %1660 = vtanh.bf16 %v725_v58 }
 0x1ce   : > { %1662 = vtanh.bf16 %v730_v55 }
 0x1cf   : > { %1664 = vtanh.bf16 %v731_v53 }
 0x1d3   : > { %v1651_v60 = vpop.eup %1650 }
 0x1d4   : > { %v1653_v62 = vpop.eup %1652  ;;  %v740_v63 = vunpack.c.l.bf16 %v1651_v60 }
 0x1d5   : > { %v1655_v0 = vpop.eup %1654  ;;  %v744_v34 = vunpack.c.l.bf16 %v1653_v62 }
 0x1d6   : > { %v1657_v38 = vpop.eup %1656  ;;  %v763_v1 = vmul.f32 %v1491_v61, %v740_v63  ;;  %v746_v5 = vunpack.c.l.bf16 %v1655_v0 }
 0x1d7   : > { %v1659_v9 = vpop.eup %1658  ;;  %v767_v32 = vmul.f32 %v1491_v61, %v744_v34  ;;  %v750_v16 = vunpack.c.l.bf16 %v1657_v38 }
 0x1d8   : > { %v1661_v13 = vpop.eup %1660  ;;  %v779_v36 = vsel %vm436_vm0, %v763_v1, 0.0  ;;  %v769_v14 = vmul.f32 %v1491_v61, %v746_v5  ;;  %v748_v24 = vunpack.c.l.bf16 %v1659_v9 }
 0x1d9   : > { %v1663_v17 = vpop.eup %1662  ;;  %780 = vadd.xlane.f32.xlu0 %v779_v36  ;;  %v791_v18 = vsel %vm436_vm0, %v767_v32, 0.0  ;;  %v742_v23 = vunpack.c.l.bf16 %v1661_v13  ;;  %v773_v30 = vmul.f32 %v1491_v61, %v750_v16 }
 0x1da   : > { %v1665_v25 = vpop.eup %1664  ;;  %792 = vadd.xlane.f32.xlu1 %v791_v18  ;;  %v797_v29 = vsel %vm436_vm0, %v769_v14, 0.0  ;;  %v771_v40 = vmul.f32 %v1491_v61, %v748_v24  ;;  %v752_v42 = vunpack.c.l.bf16 %v1663_v17 }
 0x1db   : > { %v765_v28 = vmul.f32 %v1491_v61, %v742_v23  ;;  %v754_v44 = vunpack.c.l.bf16 %v1665_v25  ;;  %v809_v47 = vsel %vm436_vm0, %v773_v30, 0.0 }
 0x1dc   : > { %v803_v46 = vsel %vm436_vm0, %v771_v40, 0.0  ;;  %v775_v35 = vmul.f32 %v1491_v61, %v752_v42 }
 0x1dd   : > { %v785_v31 = vsel %vm436_vm0, %v765_v28, 0.0  ;;  %v777_v39 = vmul.f32 %v1491_v61, %v754_v44 }
 0x1de   : > { %786 = vadd.xlane.f32.xlu0 %v785_v31  ;;  %798 = vadd.xlane.f32.xlu1 %v797_v29  ;;  %v815_v49 = vsel %vm436_vm0, %v775_v35, 0.0 }
 0x1df   : > { %v821_v51 = vsel %vm436_vm0, %v777_v39, 0.0 }
 0x1e2   : > { %804 = vadd.xlane.f32.xlu0 %v803_v46  ;;  %810 = vadd.xlane.f32.xlu1 %v809_v47 }
 0x1e6   : > { %816 = vadd.xlane.f32.xlu0 %v815_v49  ;;  %822 = vadd.xlane.f32.xlu1 %v821_v51 }
 0x266   : > { %v781_v52 = vpop.xlane.xlu0 %780 }
 0x267   : > { %v848_v54 = vmax.f32 %v781_v52, -1e+09  ;;  %v793_v43 = vpop.xlane.xlu1 %792 }
 0x268   : > { %v862_v56 = vmax.f32 %v793_v43, -1e+09 }
 0x269   : > { %v849_v57 = vrot.slane %v848_v54, 4 }
 0x26a   : > { %v863_v58 = vrot.slane %v862_v56, 4 }
 0x26b   : > { %v850_v59 = vmax.f32 %v848_v54, %v849_v57  ;;  %v787_v33 = vpop.xlane.xlu0 %786  ;;  %v799_v37 = vpop.xlane.xlu1 %798 }
 0x26c   : > { %v864_v48 = vmax.f32 %v862_v56, %v863_v58  ;;  %v855_v45 = vmax.f32 %v787_v33, -1e+09  ;;  %v869_v50 = vmax.f32 %v799_v37, -1e+09 }
 0x26d   : > { %v851_v55 = vrot.slane %v850_v59, 2 }
 0x26e   : > { %v865_v53 = vrot.slane %v864_v48, 2  ;;  %v856_v60 = vrot.slane %v855_v45, 4  ;;  %v870_v61 = vrot.slane %v869_v50, 4 }
 0x26f   : > { %v852_v62 = vmax.f32 %v850_v59, %v851_v55  ;;  %v2397_v63 = vpop.xlane.xlu0 %804  ;;  %v2399_v0 = vpop.xlane.xlu1 %810 }
 0x270   : > { %v866_v34 = vmax.f32 %v864_v48, %v865_v53  ;;  %v857_v38 = vmax.f32 %v855_v45, %v856_v60  ;;  %v871_v1 = vmax.f32 %v869_v50, %v870_v61  ;;  %v876_v5 = vmax.f32 %v2397_v63, -1e+09 }
 0x271   : > { %v853_v9 = vrot.slane %v852_v62, 1  ;;  %v883_v32 = vmax.f32 %v2399_v0, -1e+09 }
 0x272   : > { %v867_v13 = vrot.slane %v866_v34, 1  ;;  %v858_v36 = vrot.slane %v857_v38, 2  ;;  %v872_v14 = vrot.slane %v871_v1, 2  ;;  %v877_v16 = vrot.slane %v876_v5, 4 }
 0x273   : > { %v854_v17 = vmax.f32 %v852_v62, %v853_v9  ;;  %v884_v18 = vrot.slane %v883_v32, 4  ;;  %v2403_v23 = vpop.xlane.xlu0 %816  ;;  %v2406_v62 = vpop.xlane.xlu1 %822 }
 0x274   : > { %v868_v24 = vmax.f32 %v866_v34, %v867_v13  ;;  %v859_v25 = vmax.f32 %v857_v38, %v858_v36  ;;  %v873_v28 = vmax.f32 %v871_v1, %v872_v14  ;;  %v878_v29 = vmax.f32 %v876_v5, %v877_v16 }
 0x275   : > { %v904_v30 = vsub.f32 %v781_v52, %v854_v17  ;;  %v905_v31 = vsub.f32 -1e+09, %v854_v17  ;;  %v885_v40 = vmax.f32 %v883_v32, %v884_v18  ;;  %v890_v42 = vmax.f32 %v2403_v23, -1e+09 }
 0x276   : > { %v908_v44 = vsub.f32 %v793_v43, %v868_v24  ;;  %v909_v46 = vsub.f32 -1e+09, %v868_v24  ;;  %v860_v47 = vrot.slane %v859_v25, 1  ;;  %v874_v35 = vrot.slane %v873_v28, 1 }
 0x277   : > { %v920_v39 = vmul.f32 1.442695, %v904_v30  ;;  %v922_v49 = vmul.f32 1.442695, %v905_v31  ;;  %v879_v51 = vrot.slane %v878_v29, 2  ;;  %v886_v54 = vrot.slane %v885_v40, 2 }
 0x278   : > { %v928_v56 = vmul.f32 1.442695, %v908_v44  ;;  %v930_v57 = vmul.f32 1.442695, %v909_v46  ;;  %v861_v58 = vmax.f32 %v859_v25, %v860_v47  ;;  %v875_v59 = vmax.f32 %v873_v28, %v874_v35 }
 0x279   : > { %1666 = vpow2.f32 %v920_v39  ;;  %v880_v48 = vmax.f32 %v878_v29, %v879_v51  ;;  %v887_v45 = vmax.f32 %v885_v40, %v886_v54  ;;  %v891_v52 = vrot.slane %v890_v42, 4 }
 0x27a   : > { %1668 = vpow2.f32 %v922_v49  ;;  %v906_v50 = vsub.f32 %v787_v33, %v861_v58  ;;  %v907_v55 = vsub.f32 -1e+09, %v861_v58  ;;  %v910_v53 = vsub.f32 %v799_v37, %v875_v59 }
 0x27b   : > { %1670 = vpow2.f32 %v928_v56  ;;  %v911_v43 = vsub.f32 -1e+09, %v875_v59  ;;  %v881_v60 = vrot.slane %v880_v48, 1  ;;  %v888_v61 = vrot.slane %v887_v45, 1 }
 0x27c   : > { %1672 = vpow2.f32 %v930_v57  ;;  %v924_v34 = vmul.f32 1.442695, %v906_v50  ;;  %v926_v38 = vmul.f32 1.442695, %v907_v55  ;;  %v932_v1 = vmul.f32 1.442695, %v910_v53 }
 0x27d   : > { %v934_v5 = vmul.f32 1.442695, %v911_v43  ;;  %v882_v9 = vmax.f32 %v880_v48, %v881_v60  ;;  %v889_v32 = vmax.f32 %v887_v45, %v888_v61  ;;  %v892_v13 = vmax.f32 %v890_v42, %v891_v52 }
 0x27e   : > { %1674 = vpow2.f32 %v924_v34  ;;  %v897_v36 = vmax.f32 %v2406_v62, -1e+09 }
 0x27f   : > { %1676 = vpow2.f32 %v926_v38  ;;  %v912_v33 = vsub.f32 %v2397_v63, %v882_v9  ;;  %v913_v37 = vsub.f32 -1e+09, %v882_v9  ;;  %v914_v14 = vsub.f32 %v2399_v0, %v889_v32 }
 0x280   : > { %1678 = vpow2.f32 %v932_v1  ;;  %v915_v16 = vsub.f32 -1e+09, %v889_v32  ;;  %v893_v17 = vrot.slane %v892_v13, 2  ;;  %v898_v18 = vrot.slane %v897_v36, 4 }
 0x281   : > { %1680 = vpow2.f32 %v934_v5  ;;  %v936_v24 = vmul.f32 1.442695, %v912_v33  ;;  %v938_v25 = vmul.f32 1.442695, %v913_v37  ;;  %v940_v28 = vmul.f32 1.442695, %v914_v14 }
 0x282   : > { %v942_v29 = vmul.f32 1.442695, %v915_v16  ;;  %v894_v30 = vmax.f32 %v892_v13, %v893_v17  ;;  %v899_v31 = vmax.f32 %v897_v36, %v898_v18 }
 0x283   : > { %v2411_v40 = vpop.eup %1666  ;;  %1682 = vpow2.f32 %v936_v24 }
 0x284   : > { %v2413_v42 = vpop.eup %1668  ;;  %1684 = vpow2.f32 %v938_v25  ;;  %v895_v63 = vrot.slane %v894_v30, 1  ;;  %v900_v44 = vrot.slane %v899_v31, 2 }
 0x285   : > { %v2415_v0 = vpop.eup %1670  ;;  %v952_v46 = vadd.f32 %v2413_v42, %v2411_v40  ;;  %1686 = vpow2.f32 %v940_v28 }
 0x286   : > { %v2419_v47 = vpop.eup %1672  ;;  %1688 = vpow2.f32 %v942_v29  ;;  %v896_v35 = vmax.f32 %v894_v30, %v895_v63  ;;  %v901_v39 = vmax.f32 %v899_v31, %v900_v44 }
 0x287   : > { %v953_v49 = vrot.slane %v952_v46, 4  ;;  %v966_v51 = vadd.f32 %v2419_v47, %v2415_v0 }
 0x288   : > { %v2423_v54 = vpop.eup %1674  ;;  %v916_v56 = vsub.f32 %v2403_v23, %v896_v35  ;;  %v917_v57 = vsub.f32 -1e+09, %v896_v35  ;;  %v902_v58 = vrot.slane %v901_v39, 1 }
 0x289   : > { %v2426_v59 = vpop.eup %1676  ;;  %v954_v48 = vadd.f32 %v953_v49, %v952_v46  ;;  %v967_v45 = vrot.slane %v966_v51, 4 }
 0x28a   : > { %v2428_v52 = vpop.eup %1678  ;;  %v959_v50 = vadd.f32 %v2426_v59, %v2423_v54  ;;  %v944_v55 = vmul.f32 1.442695, %v916_v56  ;;  %v946_v53 = vmul.f32 1.442695, %v917_v57  ;;  %v903_v43 = vmax.f32 %v901_v39, %v902_v58 }
 0x28b   : > { %v2432_v60 = vpop.eup %1680  ;;  %v955_v61 = vrot.slane %v954_v48, 2  ;;  %v968_v34 = vadd.f32 %v967_v45, %v966_v51  ;;  %v1981_v58 = vmov 839922192  }
 0x28c   : > { %v960_v38 = vrot.slane %v959_v50, 4  ;;  %v973_v23 = vadd.f32 %v2432_v60, %v2428_v52  ;;  %1690 = vpow2.f32 %v944_v55  ;;  %v918_v1 = vsub.f32 %v2406_v62, %v903_v43 }
 0x28d   : > { %v2437_v5 = vpop.eup %1682  ;;  %v956_v9 = vadd.f32 %v955_v61, %v954_v48  ;;  %v969_v32 = vrot.slane %v968_v34, 2  ;;  %1692 = vpow2.f32 %v946_v53  ;;  %v919_v13 = vsub.f32 -1e+09, %v903_v43 }
 0x28e   : > { %v2439_v36 = vpop.eup %1684  ;;  %v961_v33 = vadd.f32 %v960_v38, %v959_v50  ;;  %v974_v37 = vrot.slane %v973_v23, 4  ;;  %v948_v14 = vmul.f32 1.442695, %v918_v1  ;;  %v1049_v48 = vunpack.c.l.s4 %v1981_v58 }
 0x28f   : > { %v2441_v16 = vpop.eup %1686  ;;  %v957_v17 = vrot.slane %v956_v9, 1  ;;  %v970_v18 = vadd.f32 %v969_v32, %v968_v34  ;;  %v980_v24 = vadd.f32 %v2439_v36, %v2437_v5  ;;  %v950_v25 = vmul.f32 1.442695, %v919_v13 }
 0x290   : > { %v2445_v62 = vpop.eup %1688  ;;  %v962_v28 = vrot.slane %v961_v33, 2  ;;  %v975_v29 = vadd.f32 %v974_v37, %v973_v23  ;;  %1694 = vpow2.f32 %v948_v14  ;;  %v1982_v53 = vmov 1985246804  }
 0x291   : > { %v958_v30 = vadd.f32 %v957_v17, %v956_v9  ;;  %v971_v31 = vrot.slane %v970_v18, 1  ;;  %v981_v63 = vrot.slane %v980_v24, 4  ;;  %v987_v44 = vadd.f32 %v2445_v62, %v2441_v16 }
 0x292   : > { %v963_v46 = vadd.f32 %v962_v28, %v961_v33  ;;  %v976_v35 = vrot.slane %v975_v29, 2  ;;  %1696 = vpow2.f32 %v950_v25  ;;  %v1056_v43 = vunpack.c.l.s4 %v1982_v53 }
 0x293   : > { %1698 = vrcp.f32 %v958_v30  ;;  %v972_v39 = vadd.f32 %v971_v31, %v970_v18  ;;  %v982_v49 = vadd.f32 %v981_v63, %v980_v24  ;;  %v988_v51 = vrot.slane %v987_v44, 4 }
 0x294   : > { %v964_v56 = vrot.slane %v963_v46, 1  ;;  %v977_v57 = vadd.f32 %v976_v35, %v975_v29  ;;  %v1050_v13 = vunpack.c.0.s8 %v1049_v48  ;;  %v1057_v17 = vunpack.c.0.s8 %v1056_v43 }
 0x295   : > { %1700 = vrcp.f32 %v972_v39  ;;  %v983_v45 = vrot.slane %v982_v49, 2  ;;  %v989_v50 = vadd.f32 %v988_v51, %v987_v44 }
 0x296   : > { %v2449_v55 = vpop.eup %1690  ;;  %v965_v61 = vadd.f32 %v964_v56, %v963_v46  ;;  %v978_v34 = vrot.slane %v977_v57, 1  ;;  %v2460_v31 = vsub.s32 %v1050_v13, %v2382_v41  ;;  %v2465_v46 = vsub.s32 %v1057_v17, %v2382_v41 }
 0x297   : > { %v2451_v38 = vpop.eup %1692  ;;  %v984_v23 = vadd.f32 %v983_v45, %v982_v49  ;;  %v990_v1 = vrot.slane %v989_v50, 2 }
 0x298   : > { %1702 = vrcp.f32 %v965_v61  ;;  %v979_v9 = vadd.f32 %v978_v34, %v977_v57  ;;  %v994_v32 = vadd.f32 %v2451_v38, %v2449_v55 }
 0x299   : > { %v985_v33 = vrot.slane %v984_v23, 1  ;;  %v991_v37 = vadd.f32 %v990_v1, %v989_v50 }
 0x29a   : > { %v2455_v14 = vpop.eup %1694  ;;  %1704 = vrcp.f32 %v979_v9  ;;  %v995_v18 = vrot.slane %v994_v32, 4 }
 0x29b   : > { %v986_v24 = vadd.f32 %v985_v33, %v984_v23  ;;  %v992_v25 = vrot.slane %v991_v37, 1 }
 0x29c   : > { %v2457_v28 = vpop.eup %1696  ;;  %v996_v29 = vadd.f32 %v995_v18, %v994_v32 }
 0x29d   : > { %v1699_v30 = vpop.eup %1698  ;;  %1706 = vrcp.f32 %v986_v24  ;;  %v993_v63 = vadd.f32 %v992_v25, %v991_v37  ;;  %v1001_v44 = vadd.f32 %v2457_v28, %v2455_v14 }
 0x29e   : > { %v1016_v35 = vmul.f32 %v1699_v30, %v2411_v40  ;;  %v1017_v39 = vmul.f32 %v1699_v30, %v2413_v42  ;;  %v997_v49 = vrot.slane %v996_v29, 2 }
 0x29f   : > { %v1701_v51 = vpop.eup %1700  ;;  %1708 = vrcp.f32 %v993_v63  ;;  %v1002_v45 = vrot.slane %v1001_v44, 4 }
 0x2a0   : > { %v1032_v56 = vpack.c.bf16 %v1017_v39, %v1016_v35  ;;  %v1020_v57 = vmul.f32 %v1701_v51, %v2415_v0  ;;  %v1021_v58 = vmul.f32 %v1701_v51, %v2419_v47  ;;  %v998_v48 = vadd.f32 %v997_v49, %v996_v29 }
 0x2a2   : > { %v1703_v50 = vpop.eup %1702  ;;  %v1054_v53 = vrot.slane %v1032_v56, %v2460_v31  ;;  %v1061_v41 = vrot.slane %v1032_v56, %v2465_v46  ;;  %v1034_v43 = vpack.c.bf16 %v1021_v58, %v1020_v57  ;;  %v999_v61 = vrot.slane %v998_v48, 1 }
 0x2a3   : > { %v1018_v40 = vmul.f32 %v1703_v50, %v2423_v54  ;;  %v1019_v42 = vmul.f32 %v1703_v50, %v2426_v59  ;;  %v1003_v54 = vadd.f32 %v1002_v45, %v1001_v44 }
 0x2a4   : > { %v1705_v34 = vpop.eup %1704  ;;  %v1176_v23 = vmul.bf16 %v1054_v53, %v2304_v2  ;;  %v1177_v0 = vmul.bf16 %v1061_v41, %v2307_v3  ;;  %v1082_v47 = vrot.slane %v1034_v43, %v2460_v31  ;;  %v1089_v1 = vrot.slane %v1034_v43, %v2465_v46 }
 0x2a5   : > { %v1033_v9 = vpack.c.bf16 %v1019_v42, %v1018_v40  ;;  %v1022_v32 = vmul.f32 %v1705_v34, %v2428_v52  ;;  %v1023_v13 = vmul.f32 %v1705_v34, %v2432_v60  ;;  %v1000_v33 = vadd.f32 %v999_v61, %v998_v48 }
 0x2a6   : > { %v1192_v37 = vunpack.c.l.bf16 %v1176_v23  ;;  %v1193_v17 = vunpack.c.l.bf16 %v1177_v0  ;;  %v1180_v3 = vmul.bf16 %v1082_v47, %v2333_v12  ;;  %v1181_v25 = vmul.bf16 %v1089_v1, %v2341_v15 }
 0x2a7   : > { %v1707_v18 = vpop.eup %1706  ;;  %v1068_v59 = vrot.slane %v1033_v9, %v2460_v31  ;;  %v1075_v2 = vrot.slane %v1033_v9, %v2465_v46  ;;  %v1035_v24 = vpack.c.bf16 %v1023_v13, %v1022_v32  ;;  %1710 = vrcp.f32 %v1000_v33 }
 0x2a8   : > { %v1208_v30 = vsel %vm436_vm0, %v1192_v37, 0.0  ;;  %v1209_v63 = vsel %vm436_vm0, %v1193_v17, 0.0  ;;  %v1024_v35 = vmul.f32 %v1707_v18, %v2437_v5  ;;  %v1004_v12 = vrot.slane %v1003_v54, 2 }
 0x2a9   : > { %v1178_v29 = vmul.bf16 %v1068_v59, %v2318_v7  ;;  %v1179_v52 = vmul.bf16 %v1075_v2, %v2321_v8  ;;  %v1096_v60 = vrot.slane %v1035_v24, %v2460_v31  ;;  %v1103_v44 = vrot.slane %v1035_v24, %v2465_v46  ;;  %v1709_v39 = vpop.eup %1708 }
 0x2aa   : > { %v1196_v56 = vunpack.c.l.bf16 %v1180_v3  ;;  %v1025_v8 = vmul.f32 %v1707_v18, %v2439_v36  ;;  %v1210_v57 = vadd.f32 %v1209_v63, %v1208_v30  ;;  %v1197_v58 = vunpack.c.l.bf16 %v1181_v25 }
 0x2ab   : > { %v1194_v49 = vunpack.c.l.bf16 %v1178_v29  ;;  %v1195_v51 = vunpack.c.l.bf16 %v1179_v52  ;;  %v1182_v15 = vmul.bf16 %v1096_v60, %v2349_v19  ;;  %v1183_v7 = vmul.bf16 %v1103_v44, %v2352_v20 }
 0x2ac   : > { %v1036_v5 = vpack.c.bf16 %v1025_v8, %v1024_v35  ;;  %v1026_v41 = vmul.f32 %v1709_v39, %v2441_v16  ;;  %v1027_v61 = vmul.f32 %v1709_v39, %v2445_v62  ;;  %v1226_v19 = vsel %vm436_vm0, %v1196_v56, 0.0 }
 0x2ad   : > { %v1217_v48 = vsel %vm436_vm0, %v1194_v49, 0.0  ;;  %v1218_v45 = vsel %vm436_vm0, %v1195_v51, 0.0  ;;  %v1198_v50 = vunpack.c.l.bf16 %v1182_v15  ;;  %v1199_v53 = vunpack.c.l.bf16 %v1183_v7 }
 0x2ae   : > { %v1219_v43 = vadd.f32 %v1218_v45, %v1217_v48  ;;  %v1110_v20 = vrot.slane %v1036_v5, %v2460_v31  ;;  %v1211_v36 = vrot.slane %v1210_v57, 4  ;;  %v1227_v42 = vsel %vm436_vm0, %v1197_v58, 0.0 }
 0x2af   : > { %v1117_v34 = vrot.slane %v1036_v5, %v2465_v46  ;;  %v1005_v23 = vadd.f32 %v1004_v12, %v1003_v54  ;;  %v1235_v0 = vsel %vm436_vm0, %v1198_v50, 0.0  ;;  %v1236_v47 = vsel %vm436_vm0, %v1199_v53, 0.0 }
 0x2b0   : > { %v1184_v16 = vmul.bf16 %v1110_v20, %v2355_v21  ;;  %v1037_v1 = vpack.c.bf16 %v1027_v61, %v1026_v41  ;;  %v1220_v9 = vrot.slane %v1219_v43, 4  ;;  %v1228_v13 = vadd.f32 %v1227_v42, %v1226_v19 }
 0x2b1   : > { %v1711_v40 = vpop.eup %1710  ;;  %v1185_v62 = vmul.bf16 %v1117_v34, %v2358_v22  ;;  %v1237_v18 = vadd.f32 %v1236_v47, %v1235_v0  ;;  %v1006_v2 = vrot.slane %v1005_v23, 1  ;;  %v1212_v24 = vadd.f32 %v1211_v36, %v1210_v57 }
 0x2b2   : > { %v1028_v32 = vmul.f32 %v1711_v40, %v2449_v55  ;;  %v1200_v33 = vunpack.c.l.bf16 %v1184_v16  ;;  %v1124_v37 = vrot.slane %v1037_v1, %v2460_v31  ;;  %v1131_v17 = vrot.slane %v1037_v1, %v2465_v46 }
 0x2b3   : > { %v1201_v54 = vunpack.c.l.bf16 %v1185_v62  ;;  %v1029_v59 = vmul.f32 %v1711_v40, %v2451_v38  ;;  %v1221_v25 = vadd.f32 %v1220_v9, %v1219_v43  ;;  %v1007_v52 = vadd.f32 %v1006_v2, %v1005_v23 }
 0x2b4   : > { %v1244_v21 = vsel %vm436_vm0, %v1200_v33, 0.0  ;;  %v1186_v3 = vmul.bf16 %v1124_v37, %v2368_v26  ;;  %v1187_v22 = vmul.bf16 %v1131_v17, %v2371_v27  ;;  %v1229_v60 = vrot.slane %v1228_v13, 4 }
 0x2b5   : > { %v1245_v55 = vsel %vm436_vm0, %v1201_v54, 0.0  ;;  %v1038_v29 = vpack.c.bf16 %v1029_v59, %v1028_v32  ;;  %v1238_v35 = vrot.slane %v1237_v18, 4  ;;  %1712 = vrcp.f32 %v1007_v52 }
 0x2b6   : > { %v1246_v30 = vadd.f32 %v1245_v55, %v1244_v21  ;;  %v1202_v63 = vunpack.c.l.bf16 %v1186_v3  ;;  %v1203_v44 = vunpack.c.l.bf16 %v1187_v22  ;;  %v1222_v27 = vrot.slane %v1221_v25, 2 }
 0x2b7   : > { %v1138_v38 = vrot.slane %v1038_v29, %v2460_v31  ;;  %v1145_v39 = vrot.slane %v1038_v29, %v2465_v46  ;;  %v1230_v15 = vadd.f32 %v1229_v60, %v1228_v13  ;;  %v1213_v8 = vrot.slane %v1212_v24, 2 }
 0x2b8   : > { %v1253_v49 = vsel %vm436_vm0, %v1202_v63, 0.0  ;;  %v1254_v26 = vsel %vm436_vm0, %v1203_v44, 0.0  ;;  %v1247_v7 = vrot.slane %v1246_v30, 4  ;;  %v1239_v57 = vadd.f32 %v1238_v35, %v1237_v18 }
 0x2b9   : > { %v1255_v51 = vadd.f32 %v1254_v26, %v1253_v49  ;;  %v1188_v12 = vmul.bf16 %v1138_v38, %v2310_v4  ;;  %v1189_v56 = vmul.bf16 %v1145_v39, %v2315_v6  ;;  %v1223_v45 = vadd.f32 %v1222_v27, %v1221_v25 }
 0x2ba   : > { %v1231_v41 = vrot.slane %v1230_v15, 2  ;;  %v1248_v61 = vadd.f32 %v1247_v7, %v1246_v30  ;;  %v1214_v19 = vadd.f32 %v1213_v8, %v1212_v24  ;;  %v1240_v20 = vrot.slane %v1239_v57, 2 }
 0x2bb   : > { %v1204_v58 = vunpack.c.l.bf16 %v1188_v12  ;;  %v1205_v48 = vunpack.c.l.bf16 %v1189_v56  ;;  %v1256_v5 = vrot.slane %v1255_v51, 4  ;;  %v1224_v6 = vrot.slane %v1223_v45, 1 }
 0x2bc   : > { %v1232_v42 = vadd.f32 %v1231_v41, %v1230_v15  ;;  %v1249_v0 = vrot.slane %v1248_v61, 2  ;;  %v1215_v47 = vrot.slane %v1214_v19, 1  ;;  %v1241_v16 = vadd.f32 %v1240_v20, %v1239_v57 }
 0x2bd   : > { %v1262_v50 = vsel %vm436_vm0, %v1204_v58, 0.0  ;;  %v1263_v53 = vsel %vm436_vm0, %v1205_v48, 0.0  ;;  %v1257_v36 = vadd.f32 %v1256_v5, %v1255_v51  ;;  %v1225_v62 = vadd.f32 %v1224_v6, %v1223_v45 }
 0x2be   : > { %v1264_v43 = vadd.f32 %v1263_v53, %v1262_v50  ;;  %v1233_v37 = vrot.slane %v1232_v42, 1  ;;  %v1250_v17 = vadd.f32 %v1249_v0, %v1248_v61  ;;  %v1216_v18 = vadd.f32 %v1215_v47, %v1214_v19 }
 0x2bf   : > { %v1713_v40 = vpop.eup %1712  ;;  %v1258_v32 = vrot.slane %v1257_v36, 2  ;;  %v1242_v54 = vrot.slane %v1241_v16, 1 }
 0x2c0   : > { %v1265_v4 = vrot.slane %v1264_v43, 4  ;;  %v1030_v34 = vmul.f32 %v1713_v40, %v2455_v14  ;;  %v1031_v23 = vmul.f32 %v1713_v40, %v2457_v28  ;;  %v1289_v24 = vsel %vm1288_vm3, %v1225_v62, %v1216_v18 }
 0x2c1   : > { %v1259_v2 = vadd.f32 %v1258_v32, %v1257_v36  ;;  %v1234_v22 = vadd.f32 %v1233_v37, %v1232_v42  ;;  %v1251_v25 = vrot.slane %v1250_v17, 1 }
 0x2c2   : > { %v1039_v1 = vpack.c.bf16 %v1031_v23, %v1030_v34  ;;  %v1266_v9 = vadd.f32 %v1265_v4, %v1264_v43 }
 0x2c3   : > { %v1291_v52 = vsel %vm1290_vm4, %v1234_v22, %v1289_v24 }
 0x2c4   : > { %v1152_v13 = vrot.slane %v1039_v1, %v2460_v31  ;;  %v1159_v33 = vrot.slane %v1039_v1, %v2465_v46  ;;  %v1267_v59 = vrot.slane %v1266_v9, 2  ;;  %v1243_v31 = vadd.f32 %v1242_v54, %v1241_v16 }
 0x2c6   : > { %v1190_v14 = vmul.bf16 %v1152_v13, %v2326_v10  ;;  %v1191_v28 = vmul.bf16 %v1159_v33, %v2329_v11  ;;  %v1268_v29 = vadd.f32 %v1267_v59, %v1266_v9  ;;  %v1260_v10 = vrot.slane %v1259_v2, 1 }
 0x2c7   : > { %v1252_v11 = vadd.f32 %v1251_v25, %v1250_v17  ;;  %v1293_v63 = vsel %vm1292_vm5, %v1243_v31, %v1291_v52 }
 0x2c8   : > { %v1206_v21 = vunpack.c.l.bf16 %v1190_v14  ;;  %v1207_v3 = vunpack.c.l.bf16 %v1191_v28  ;;  %v1269_v44 = vrot.slane %v1268_v29, 1  ;;  %v1261_v35 = vadd.f32 %v1260_v10, %v1259_v2 }
 0x2c9   : > { %v1295_v39 = vsel %vm1294_vm6, %v1252_v11, %v1293_v63 }
 0x2ca   : > { %v1271_v46 = vsel %vm436_vm0, %v1206_v21, 0.0  ;;  %v1272_v55 = vsel %vm436_vm0, %v1207_v3, 0.0  ;;  %v1270_v26 = vadd.f32 %v1269_v44, %v1268_v29  ;;  %v1297_v51 = vsel %vm1296_vm7, %v1261_v35, %v1295_v39 }
 0x2cb   : > { %v1273_v60 = vadd.f32 %v1272_v55, %v1271_v46 }
 0x2cc   : > { %v1299_v56 = vsel %vm1298_vm8, %v1270_v26, %v1297_v51 }
 0x2cd   : > { %v1274_v30 = vrot.slane %v1273_v60, 4 }
 0x2cf   : > { %v1275_v38 = vadd.f32 %v1274_v30, %v1273_v60 }
 0x2d1   : > { %v1276_v49 = vrot.slane %v1275_v38, 2 }
 0x2d3   : > { %v1277_v27 = vadd.f32 %v1276_v49, %v1275_v38 }
 0x2d5   : > { %v1278_v12 = vrot.slane %v1277_v27, 1 }
 0x2d7   : > { %v1279_v15 = vadd.f32 %v1278_v12, %v1277_v27 }
 0x2d9   : > { %v1301_v7 = vsel %vm1300_vm9, %v1279_v15, %v1299_v56 }
 0x2da   : > { %1303 = vst.msk [vmem:[%s361_s30] sm:$0xff] %vm436_vm0, %v1301_v7 }
 0x2db   : > { %1899 = shalt.err (!%p1896_p10)
}
 0x2dc   : > { %s1900_s4 = scalar_lea.hbm %s2536_s7, 128  ;;  %s1904_s9 = scalar_lea.hbm %s2587_s6, 256 }
 0x2dd   : > { %p1901_p11 = scmp.ne.s32.totalorder %s2536_s7, %s1900_s4  ;;  %p1905_p7 = scmp.lt.u32.totalorder %s2536_s7, %s2587_s6 }
 0x2de   : > { %p1906_p12 = scmp.lt.u32.totalorder %s1904_s9, %s1900_s4  ;;  %p1908_p2 = scmp.lt.u32.totalorder %s1900_s4, %s2536_s7 }
 0x2df   : > { %p1902_p9 = pnand %p1901_p11, %p2621_p13 }
 0x2e0   : > { %p1907_p1 = por %p1906_p12, %p1905_p7 }
 0x2e1   : > { %p1903_p5 = pneg %p1902_p9 }
 0x2e2   : > { %p1909_p0 = por %p1908_p2, %p1907_p1 }
 0x2e4   : > { %p1910_p6 = pnand %p1909_p0, %p1903_p5 }
 0x2e6   : > { %1913 = shalt.err (!%p1910_p6)
}
 0x2e7   : > { %1560 = dma.vmem_to_hbm [thread:$0]  (%p2621_p13), %s2538_s12, 128, %s2536_s7, %s1305_s2  }
 0x2e8 PF: > { %s1330_s29 = sand.u32 1, %s1956_s21   ;;  %p2622_p3 = scmp.ne.s32.totalorder %s2599_s28, 0 }
 0x2e9   : > { %p2623_p8 = scmp.ge.s32.totalorder %s1968_s24, 2  ;;  %s1331_s14 = scalar_lea.sflag [#allocation4], %s1330_s29 }
 0x2eb   : > { %p1583_p4 = pnand %p2623_p8, %p2622_p3 }
 0x2ed   : > { %1951 = dma.done.wait (!%p1583_p4), %s1331_s14, 128  }
 0x2ee   : > { %1953 = vsyncadd (!%p1583_p4), %s1331_s14, 4294967168  ;;  %p24_p10 = scmp.ge.s32.totalorder %s2174_s18, 4   ;;  %s2624_s21 = smov %s1960_s22 }
 0x2ef   : > { %s2625_s22 = smov %s1964_s23  ;;  %s2626_s23 = smov %s2190_s19 }
 0x2f0   : > { %s2627_s24 = smov %s2174_s18  ;;  %26 = sbr.rel (!%p24_p10) target bundleno = 14 (0xe), region = 118 }
 0x2f7   :  { %1336 = vsyncpa [#allocation3], 1 }
 0x2f8   :  { %1338 = vsyncpa [#allocation3 + $0x1], 1 }
 0x2f9   :  { %1339 = vsyncpa [#allocation6], 1 }
 0x2fa   :  { %1341 = vsyncpa [#allocation6 + $0x1], 1 }
 0x2fb   :  { %1342 = vsyncpa [#allocation9], 1 }
 0x2fc   :  { %1343 = vsyncpa [#allocation12], 1 }
 0x2fd   :  { %1344 = vsyncpa [#allocation4], 1 }
 0x2fe   :  { %1346 = vsyncpa [#allocation4 + $0x1], 1 }

// kernel: tpu_custom_call.1
= control target key start
LH: loop header
LB: loop body
LE: loop exit
PB: predicated region body
PF: predicated region fallthrough
CT: control target
= control target key end

     0   :  { %s2581_s0 = inlined_call_operand.hbm [shape: bf16[16,16,32], index: 0, kind: input, shape index: {}]   ;;  %s2582_s1 = inlined_call_operand.hbm [shape: bf16[16,16], index: 1, kind: input, shape index: {}]   ;;  %s2583_s2 = inlined_call_operand.hbm [shape: bf16[32,32], index: 2, kind: input, shape index: {}]   ;;  %s2584_s3 = inlined_call_operand.hbm [shape: bf16[16,32], index: 3, kind: input, shape index: {}]   ;;  %s2585_s4 = inlined_call_operand.hbm [shape: f32[1,32], index: 4, kind: input, shape index: {}]   ;;  %s2586_s5 = inlined_call_operand.hbm [shape: f32[1,1,32], index: 5, kind: input, shape index: {}]   ;;  %s2587_s6 = inlined_call_operand.hbm [shape: f32[16,32], index: 6, kind: output, shape index: {}]  }
   0x1   :  { %2594 = sst [smem:[#allocation20_spill]] %s2581_s0 }
   0x2   :  { %2595 = sst [smem:[#allocation21_spill]] %s2583_s2 }
   0x3   :  { %2596 = sst [smem:[#allocation22_spill]] %s2584_s3 }
   0x4   :  { %2597 = sst [smem:[#allocation23_spill]] %s2585_s4 }
   0x5   :  { %11 = vsyncpa [#allocation3], 0 }
   0x6   :  { %13 = vsyncpa [#allocation3 + $0x1], 0 }
   0x7   :  { %14 = vsyncpa [#allocation6], 0 }
   0x8   :  { %16 = vsyncpa [#allocation6 + $0x1], 0 }
   0x9   :  { %17 = vsyncpa [#allocation9], 0 }
   0xa   :  { %18 = vsyncpa [#allocation12], 0 }
   0xb   :  { %19 = vsyncpa [#allocation4], 0 }
   0xc   :  { %21 = vsyncpa [#allocation4 + $0x1], 0  ;;  %s2019_s21 = smov 0   ;;  %s2021_s22 = smov 0  }
   0xd   :  { %s2023_s23 = smov 0   ;;  %s2025_s24 = smov 0  }
   0xe LB: > { %s2040_s25 = sadd.s32 4294967295, %s1968_s24   ;;  %s1449_s26 = sadd.s32 4294967294, %s1968_s24   ;;  %s1968_s24 = sphi %s2025_s24, %s2627_s24   ;;  %s1964_s23 = sphi %s2023_s23, %s2626_s23   ;;  %s1960_s22 = sphi %s2021_s22, %s2625_s22   ;;  %s1956_s21 = sphi %s2019_s21, %s2624_s21  }
   0xf   : > { %p47_p0 = scmp.ne.s32.totalorder %s1960_s22, %s1956_s21  ;;  %p2588_p1 = scmp.eq.s32.totalorder %s2040_s25, 0 }
  0x10   : > { %p187_p3 = scmp.eq.s32.totalorder %s1449_s26, 1  ;;  %p1450_p5 = scmp.ge.s32.totalorder %s1968_s24, 1 }
  0x11   : > { %p2049_p4 = por %p2588_p1, %p47_p0  ;;  %p194_p7 = scmp.lt.s32.totalorder %s1968_s24, 3 }
  0x12   : > { %p2054_p6 = por %p187_p3, %p47_p0  ;;  %s1970_s30 = smov [#allocation7]  }
  0x13   : > { %s2598_s27 = scalar_select %p2049_p4, 1, 0 }
  0x14   : > { %s2599_s28 = scalar_select %p2054_p6, 1, 0 }
  0x15   : > { %p2059_p8 = pnand %p1450_p5, %p194_p7  ;;  %s206_s7 = sshll.u32 %s1970_s30, 4  ;;  %s2063_s7 = int_to_ptr.vmem [resolvable:$true] %s206_s7 }
  0x16   : > { %s1971_s9 = smov [#allocation8]   ;;  %s1972_s11 = smov [#allocation10]  }
  0x17   : > { %s2600_s29 = scalar_select %p2059_p8, 1, 0 }
  0x18   : > { %p1562_p9 = pneg %p2059_p8  ;;  %s219_s10 = sshll.u32 %s1971_s9, 4  ;;  %s2074_s10 = int_to_ptr.vmem [resolvable:$true] %s219_s10 }
  0x19   : > { %s2076_s12 = sshll.u32 %s1972_s11, 4  ;;  %s2602_s2 = sld [smem:[#allocation21_spill]]  ;;  %s234_s12 = int_to_ptr.vmem [resolvable:$true] %s2076_s12 }
  0x1a   : > { %p2070_p11 = pnand %p1562_p9, %p2588_p1 }
  0x1c   : > { %p2086_p13 = pneg %p2070_p11 }
  0x1f   : > { %s1714_s15 = scalar_lea.hbm %s2602_s2, 256 }
  0x20   : > { %p1715_p12 = scmp.ne.s32.totalorder %s2602_s2, %s1714_s15  ;;  %p1721_p5 = scmp.lt.u32.totalorder %s1714_s15, %s2602_s2 }
  0x22   : > { %p1717_p0 = pnand %p2086_p13, %p1715_p12 }
  0x24   : > { %p1718_p3 = pneg %p1717_p0 }
  0x26   : > { %p1723_p7 = pnand %p1721_p5, %p1718_p3 }
  0x28   : > { %1726 = shalt.err (!%p1723_p7)
}
  0x29   : > { %s1727_s26 = scalar_lea.vmem %s2063_s7, 256  ;;  %p1735_p2 = scmp.lt.s32.totalorder %s2063_s7, %s2063_s7 }
  0x2a   : > { %p1728_p9 = scmp.ne.s32.totalorder %s2063_s7, %s1727_s26  ;;  %p1736_p6 = scmp.lt.s32.totalorder %s1727_s26, %s1727_s26 }
  0x2c   : > { %p1730_p10 = pnand %p1728_p9, %p2086_p13  ;;  %p1737_p12 = por %p1736_p6, %p1735_p2 }
  0x2e   : > { %p1731_p1 = pneg %p1730_p10 }
  0x30   : > { %p1738_p0 = pnand %p1737_p12, %p1731_p1 }
  0x32   : > { %1741 = shalt.err (!%p1738_p0)
}
  0x33   : > { %s2591_s30 = smov 64   ;;  %s2592_s9 = smov 4  }
  0x34   : > { %1565 = dma.hbm_to_vmem [thread:$0]  (!%p2070_p11), %s2602_s2, 256, %s2063_s7, [#allocation6], %s2591_s30, %s2591_s30, %s2592_s9  }
  0x35   : > { %s2604_s3 = sld [smem:[#allocation22_spill]] }
  0x3b   : > { %s1742_s16 = scalar_lea.hbm %s2604_s3, 128 }
  0x3c   : > { %p1743_p1 = scmp.ne.s32.totalorder %s2604_s3, %s1742_s16  ;;  %p1749_p10 = scmp.lt.u32.totalorder %s1742_s16, %s2604_s3 }
  0x3e   : > { %p1745_p2 = pnand %p1743_p1, %p2086_p13 }
  0x40   : > { %p1746_p6 = pneg %p1745_p2 }
  0x42   : > { %p1751_p3 = pnand %p1749_p10, %p1746_p6 }
  0x44   : > { %1754 = shalt.err (!%p1751_p3)
}
  0x45   : > { %s1755_s7 = scalar_lea.vmem %s2074_s10, 128  ;;  %p1763_p12 = scmp.lt.s32.totalorder %s2074_s10, %s2074_s10 }
  0x46   : > { %p1756_p5 = scmp.ne.s32.totalorder %s2074_s10, %s1755_s7  ;;  %p1764_p0 = scmp.lt.s32.totalorder %s1755_s7, %s1755_s7 }
  0x48   : > { %p1758_p7 = pnand %p1756_p5, %p2086_p13  ;;  %p1765_p1 = por %p1764_p0, %p1763_p12 }
  0x4a   : > { %p1759_p9 = pneg %p1758_p7 }
  0x4c   : > { %p1766_p2 = pnand %p1765_p1, %p1759_p9 }
  0x4e   : > { %1769 = shalt.err (!%p1766_p2)
}
  0x4f   : > { %1568 = dma.hbm_to_vmem [thread:$0]  (!%p2070_p11), %s2604_s3, 128, %s2074_s10, [#allocation9], %s2591_s30, %s2591_s30, %s2592_s9  }
  0x50   : > { %s2605_s4 = sld [smem:[#allocation23_spill]] }
  0x56   : > { %s1770_s16 = scalar_lea.hbm %s2605_s4, 16 }
  0x57   : > { %p1771_p6 = scmp.ne.s32.totalorder %s2605_s4, %s1770_s16  ;;  %p1777_p5 = scmp.lt.u32.totalorder %s1770_s16, %s2605_s4 }
  0x59   : > { %p1773_p10 = pnand %p1771_p6, %p2086_p13 }
  0x5b   : > { %p1774_p3 = pneg %p1773_p10 }
  0x5d   : > { %p1779_p7 = pnand %p1777_p5, %p1774_p3 }
  0x5f   : > { %1782 = shalt.err (!%p1779_p7)
}
  0x60   : > { %s1783_s7 = scalar_lea.vmem %s234_s12, 16  ;;  %s1790_s10 = scalar_lea.vmem %s234_s12, 32 }
  0x61   : > { %p1784_p9 = scmp.ne.s32.totalorder %s234_s12, %s1783_s7  ;;  %p1791_p1 = scmp.lt.s32.totalorder %s234_s12, %s234_s12 }
  0x62   : > { %p1792_p2 = scmp.lt.s32.totalorder %s1790_s10, %s1783_s7 }
  0x63   : > { %p1786_p12 = pnand %p1784_p9, %p2086_p13 }
  0x64   : > { %p1793_p4 = por %p1792_p2, %p1791_p1 }
  0x65   : > { %p1787_p0 = pneg %p1786_p12 }
  0x67   : > { %p1794_p8 = pnand %p1793_p4, %p1787_p0 }
  0x69   : > { %1797 = shalt.err (!%p1794_p8)
}
  0x6a   : > { %1571 = dma.hbm_to_vmem [thread:$0]  (!%p2070_p11), %s2605_s4, 16, %s234_s12, [#allocation9]  }
  0x6b   : > { %s1975_s14 = smov [#allocation11]   ;;  %s1798_s19 = scalar_lea.hbm %s2586_s5, 16 }
  0x6c   : > { %s244_s15 = sshll.u32 %s1975_s14, 4  ;;  %p1799_p6 = scmp.ne.s32.totalorder %s2586_s5, %s1798_s19  ;;  %s245_s15 = int_to_ptr.vmem [resolvable:$true] %s244_s15 }
  0x6d   : > { %p1805_p10 = scmp.lt.u32.totalorder %s1798_s19, %s2586_s5 }
  0x6e   : > { %p1801_p4 = pnand %p1799_p6, %p2086_p13 }
  0x70   : > { %p1802_p8 = pneg %p1801_p4 }
  0x72   : > { %p1807_p3 = pnand %p1805_p10, %p1802_p8 }
  0x74   : > { %1810 = shalt.err (!%p1807_p3)
}
  0x75   : > { %s1811_s12 = scalar_lea.vmem %s245_s15, 16  ;;  %s1818_s11 = scalar_lea.vmem %s245_s15, 32 }
  0x76   : > { %p1812_p5 = scmp.ne.s32.totalorder %s245_s15, %s1811_s12  ;;  %p1819_p12 = scmp.lt.s32.totalorder %s245_s15, %s245_s15 }
  0x77   : > { %p1820_p0 = scmp.lt.s32.totalorder %s1818_s11, %s1811_s12 }
  0x78   : > { %p1814_p7 = pnand %p1812_p5, %p2086_p13 }
  0x79   : > { %p1821_p1 = por %p1820_p0, %p1819_p12 }
  0x7a   : > { %p1815_p9 = pneg %p1814_p7 }
  0x7c   : > { %p1822_p2 = pnand %p1821_p1, %p1815_p9 }
  0x7e   : > { %1825 = shalt.err (!%p1822_p2)
}
  0x7f   : > { %1574 = dma.hbm_to_vmem [thread:$0]  (!%p2070_p11), %s2586_s5, 16, %s245_s15, [#allocation12]  }
  0x80   : > { %s2174_s18 = sadd.s32 1, %s1968_s24   ;;  %s34_s16 = sadd.s32 1, %s1964_s23 }
  0x81   : > { %s31_s8 = ssub.s32 %s1968_s24, %s2174_s18  ;;  %p41_p13 = scmp.ne.s32.totalorder %s1964_s23, %s1960_s22 }
  0x82   : > { %p32_p6 = scmp.eq.s32.totalorder %s31_s8, 0  ;;  %p42_p4 = scmp.eq.s32.totalorder %s1968_s24, 0 }
  0x83   : > { %p2606_p8 = scmp.eq.s32.totalorder %s2040_s25, 1  ;;  %p1590_p3 = scmp.lt.s32.totalorder %s1968_s24, 2 }
  0x84   : > { %s2190_s19 = scalar_select %p32_p6, %s1964_s23, %s34_s16  }
  0x85   : > { %p2184_p10 = por %p2606_p8, %p41_p13  ;;  %p43_p5 = por %p42_p4, %p41_p13 }
  0x86   : > { %s2193_s20 = sand.u32 1, %s1964_s23   ;;  %s1497_s26 = sshll.u32 %s1968_s24, 10 }
  0x87   : > { %s2607_s17 = scalar_select %p2184_p10, 1, 0 }
  0x88   : > { %s1456_s15 = sshll.u32 %s2193_s20, 6  ;;  %s2608_s0 = sld [smem:[#allocation20_spill]] }
  0x89   : > { %s259_s11 = scalar_lea.vmem [#allocation2], %s1456_s15  ;;  %p2204_p11 = pnand %p1590_p3, %p43_p5 }
  0x8a   : > { %s267_s13 = sshll.u32 %s259_s11, 4  ;;  %s1460_s8 = sshll.u32 %s2193_s20, 2  ;;  %s2202_s13 = int_to_ptr.vmem [resolvable:$true] %s267_s13 }
  0x8b   : > { %s256_s30 = scalar_lea.sflag [#allocation3], %s2193_s20  ;;  %p1828_p9 = pneg %p2204_p11 }
  0x8e   : > { %s2200_s12 = scalar_lea.hbm %s2608_s0, %s1497_s26  ;;  %s1831_s10 = scalar_lea.hbm %s2608_s0, 2048 }
  0x8f   : > { %s1826_s7 = scalar_lea.hbm %s2200_s12, 1024  ;;  %p1832_p1 = scmp.lt.u32.totalorder %s2200_s12, %s2608_s0 }
  0x90   : > { %p1827_p7 = scmp.ne.s32.totalorder %s2200_s12, %s1826_s7  ;;  %p1833_p2 = scmp.lt.u32.totalorder %s1831_s10, %s1826_s7 }
  0x91   : > { %p1835_p6 = scmp.lt.u32.totalorder %s1826_s7, %s2200_s12 }
  0x92   : > { %p1829_p12 = pnand %p1828_p9, %p1827_p7  ;;  %p1834_p13 = por %p1833_p2, %p1832_p1 }
  0x94   : > { %p1830_p0 = pneg %p1829_p12  ;;  %p1836_p4 = por %p1835_p6, %p1834_p13 }
  0x96   : > { %p1837_p8 = pnand %p1836_p4, %p1830_p0 }
  0x98   : > { %1840 = shalt.err (!%p1837_p8)
}
  0x99   : > { %s1841_s16 = scalar_lea.vmem %s2202_s13, 1024  ;;  %s1976_s15 = smov [#allocation2]  }
  0x9a   : > { %p1842_p3 = scmp.ne.s32.totalorder %s2202_s13, %s1841_s16  ;;  %s1846_s26 = sshll.u32 %s1976_s15, 4  ;;  %s1847_s26 = int_to_ptr.vmem [resolvable:$false] %s1846_s26 }
  0x9b   : > { %s1848_s9 = scalar_lea.vmem %s1847_s26, 2048  ;;  %p1849_p12 = scmp.lt.s32.totalorder %s2202_s13, %s1847_s26 }
  0x9c   : > { %p1844_p5 = pnand %p1842_p3, %p1828_p9  ;;  %p1850_p1 = scmp.lt.s32.totalorder %s1848_s9, %s1841_s16 }
  0x9e   : > { %p1845_p7 = pneg %p1844_p5  ;;  %p1851_p2 = por %p1850_p1, %p1849_p12 }
  0xa0   : > { %p1852_p13 = pnand %p1851_p2, %p1845_p7 }
  0xa2   : > { %1855 = shalt.err (!%p1852_p13)
}
  0xa3   : > { %s2610_s7 = smov 4   ;;  %s2611_s10 = smov 64  }
  0xa4   : > { %1578 = dma.hbm_to_vmem [thread:$0]  (!%p2204_p11), %s2200_s12, 1024, %s2202_s13, %s256_s30, %s2611_s10, %s2611_s10, %s2610_s7  }
  0xa5   : > { %s1461_s11 = sshll.u32 %s1968_s24, 6  ;;  %s281_s9 = scalar_lea.vmem [#allocation5], %s1460_s8 }
  0xa6   : > { %s2245_s26 = scalar_lea.hbm %s2582_s1, %s1461_s11  ;;  %s288_s0 = sshll.u32 %s281_s9, 4  ;;  %s289_s0 = int_to_ptr.vmem [resolvable:$true] %s288_s0 }
  0xa7   : > { %s2612_s2 = sand.u32 1, %s1968_s24   ;;  %s1856_s4 = scalar_lea.hbm %s2245_s26, 64 }
  0xa8   : > { %s278_s3 = scalar_lea.sflag [#allocation6], %s2612_s2  ;;  %p1857_p0 = scmp.ne.s32.totalorder %s2245_s26, %s1856_s4 }
  0xa9   : > { %s1861_s13 = scalar_lea.hbm %s2582_s1, 128  ;;  %p1862_p8 = scmp.lt.u32.totalorder %s2245_s26, %s2582_s1 }
  0xaa   : > { %p1859_p6 = pnand %p1857_p0, %p1828_p9  ;;  %p1863_p3 = scmp.lt.u32.totalorder %s1861_s13, %s1856_s4 }
  0xab   : > { %p1865_p7 = scmp.lt.u32.totalorder %s1856_s4, %s2245_s26 }
  0xac   : > { %p1860_p4 = pneg %p1859_p6  ;;  %p1864_p5 = por %p1863_p3, %p1862_p8 }
  0xae   : > { %p1866_p12 = por %p1865_p7, %p1864_p5 }
  0xb0   : > { %p1867_p1 = pnand %p1866_p12, %p1860_p4 }
  0xb2   : > { %1870 = shalt.err (!%p1867_p1)
}
  0xb3   : > { %s1871_s2 = scalar_lea.vmem %s289_s0, 64  ;;  %s1977_s8 = smov [#allocation5]  }
  0xb4   : > { %p1872_p2 = scmp.ne.s32.totalorder %s289_s0, %s1871_s2  ;;  %s1876_s10 = sshll.u32 %s1977_s8, 4  ;;  %s1877_s10 = int_to_ptr.vmem [resolvable:$false] %s1876_s10 }
  0xb5   : > { %s1878_s11 = scalar_lea.vmem %s1877_s10, 128  ;;  %p1879_p6 = scmp.lt.s32.totalorder %s289_s0, %s1877_s10 }
  0xb6   : > { %p1874_p13 = pnand %p1872_p2, %p1828_p9  ;;  %p1880_p10 = scmp.lt.s32.totalorder %s1878_s11, %s1871_s2 }
  0xb8   : > { %p1875_p0 = pneg %p1874_p13  ;;  %p1881_p3 = por %p1880_p10, %p1879_p6 }
  0xba   : > { %p1882_p8 = pnand %p1881_p3, %p1875_p0 }
  0xbc   : > { %1885 = shalt.err (!%p1882_p8)
}
  0xbd   : > { %1581 = dma.hbm_to_vmem [thread:$0]  (!%p2204_p11), %s2245_s26, 64, %s289_s0, %s278_s3  }
  0xbe   : > { %p2613_p4 = scmp.ne.s32.totalorder %s2600_s29, 0 }
  0xbf   : > { %s2273_s4 = sand.u32 (!%p2613_p4), 1, %s1960_s22   ;;  %p2614_p10 = scmp.ne.s32.totalorder (!%p2613_p4), %s2598_s27, 0 }
  0xc0   : > { %297 = sbr.rel (%p2613_p4) target bundleno = 744 (0x2e8), region = 44  ;;  %s1463_s15 = sshll.u32 (!%p2613_p4), %s2273_s4, 6 }
  0xc1   : > { %s300_s16 = scalar_lea.sflag (!%p2613_p4), [#allocation3], %s2273_s4  ;;  %s2277_s9 = scalar_lea.vmem (!%p2613_p4), [#allocation2], %s1463_s15 }
  0xc7   : > { %1931 = dma.done.wait (%p2614_p10), %s300_s16, 1024  }
  0xc8   : > { %1933 = vsyncadd (%p2614_p10), %s300_s16, 4294966272  ;;  %s308_s0 = sand.u32 1, %s2040_s25   ;;  %s1464_s3 = sshll.u32 %s2273_s4, 2 }
  0xc9   : > { %s309_s29 = scalar_lea.sflag [#allocation6], %s308_s0  ;;  %s2285_s14 = scalar_lea.vmem [#allocation5], %s1464_s3 }
  0xca   : > { %1935 = dma.done.wait (%p2614_p10), %s309_s29, 64  }
  0xcb   : > { %1937 = vsyncadd (%p2614_p10), %s309_s29, 4294967232  ;;  %p2615_p11 = scmp.eq.s32.totalorder %s2040_s25, 0 }
  0xcd   : > { %1939 = dma.done.wait (%p2615_p11), [#allocation6], 256   ;;  %p2616_p9 = pmov %p2615_p11 }
  0xcf   : > { %1941 = vsyncadd (%p2616_p9), [#allocation6], 4294967040  ;;  %p2617_p5 = pmov %p2616_p9 }
  0xd1   : > { %1943 = dma.done.wait (%p2617_p5), [#allocation9], 144   ;;  %p2618_p7 = pmov %p2617_p5 }
  0xd2   : > { %p2619_p12 = pmov %p2617_p5 }
  0xd3   : > { %1945 = vsyncadd (%p2618_p7), [#allocation9], 4294967152 }
  0xd4   : > { %1947 = dma.done.wait (%p2619_p12), [#allocation12], 16   ;;  %p2620_p1 = pmov %p2617_p5 }
  0xd5   : > { %v1639_v0 = vld [vmem:[#allocation7] sm:$0xff]   ;;  %v1640_v1 = vld [vmem:[#allocation7 + $0x8] sm:$0xff]   ;;  %vm436_vm0 = vcmask 261120   ;;  %v2304_v2 = vld [vmem:[%s2277_s9] sm:$0xf]  ;;  %v1978_v18 = vmov 0.0   ;;  %v623_v31 = vlaneseq }
  0xd6   : > { %1949 = vsyncadd (%p2620_p1), [#allocation12], 4294967280  ;;  %1510 = vmatprep.subr.bf16.mxu0 %v1639_v0  ;;  %1536 = vmatprep.subr.bf16.mxu1 %v1639_v0  ;;  %v2307_v3 = vld [vmem:[%s2277_s9 + $0x4] sm:$0xf]  ;;  %v2310_v4 = vld [vmem:[%s2277_s9 + $0x30] sm:$0xf] }
  0xd7   : > { %1511 = vmatpush3.bf16.msra.mxu0 %v1639_v0  ;;  %1538 = vmatpush3.bf16.msra.mxu1 %v1639_v0  ;;  %v1470_v5 = vcombine.low %v2304_v2, %v2307_v3  ;;  %v2315_v6 = vld [vmem:[%s2277_s9 + $0x34] sm:$0xf]  ;;  %v2318_v7 = vld [vmem:[%s2277_s9 + $0x8] sm:$0xf]  ;;  %v2321_v8 = vld [vmem:[%s2277_s9 + $0xc] sm:$0xf] }
  0xd8   : > { %1512 = vmatprep.subr.bf16.mxu0 %v1640_v1  ;;  %1537 = vmatprep.subr.bf16.mxu1 %v1640_v1  ;;  %v1476_v9 = vcombine.low %v2310_v4, %v2315_v6  ;;  %v2326_v10 = vld [vmem:[%s2277_s9 + $0x38] sm:$0xf]  ;;  %v2329_v11 = vld [vmem:[%s2277_s9 + $0x3c] sm:$0xf]  ;;  %v2333_v12 = vld [vmem:[%s2277_s9 + $0x10] sm:$0xf]  ;;  %v1471_v13 = vcombine.low %v2318_v7, %v2321_v8 }
  0xd9   : > { %1514 = vmatprep.mubr.msk.bf16.mxu0 %vm436_vm0, %v1470_v5  ;;  %v1477_v14 = vcombine.low %v2326_v10, %v2329_v11  ;;  %v2341_v15 = vld [vmem:[%s2277_s9 + $0x14] sm:$0xf]  ;;  %v1645_v16 = vld [vmem:[#allocation8] sm:$0xff]   ;;  %vm1979_vm1 = vmmov 0   ;;  %v2355_v21 = vld [vmem:[%s2277_s9 + $0x20] sm:$0xf] }
  0xda   : > { %1526 = vmatprep.mubr.msk.bf16.mxu1 %vm436_vm0, %v1476_v9  ;;  %v1472_v17 = vcombine.low %v2333_v12, %v2341_v15  ;;  %v2349_v19 = vld [vmem:[%s2277_s9 + $0x18] sm:$0xf]  ;;  %v2352_v20 = vld [vmem:[%s2277_s9 + $0x1c] sm:$0xf]  ;;  %v2358_v22 = vld [vmem:[%s2277_s9 + $0x24] sm:$0xf] }
  0xdb   : > { %1513 = vmatpush3.bf16.msra.mxu0 %v1640_v1  ;;  %1539 = vmatpush3.bf16.msra.mxu1 %v1640_v1  ;;  %v1473_v23 = vcombine.low %v2349_v19, %v2352_v20  ;;  %v558_v24 = vld [vmem:[%s2285_s14] sm:$0xf]  ;;  %vm574_vm2 = vcmask 130048   ;;  %v1474_v25 = vcombine.low %v2355_v21, %v2358_v22  ;;  %v2368_v26 = vld [vmem:[%s2277_s9 + $0x28] sm:$0xf]  ;;  %v2382_v41 = vshrl.u32 %v623_v31, 7 }
  0xdc   : > { %1530 = vmatprep.subr.bf16.mxu1 %v1978_v18  ;;  %v2371_v27 = vld [vmem:[%s2277_s9 + $0x2c] sm:$0xf]  ;;  %v1980_v29 = vmov 1966171168   ;;  %v1488_v42 = vld [vmem:[#allocation10] ss:$0 sm:$0xff] }
  0xdd   : > { %v1475_v28 = vcombine.low %v2368_v26, %v2371_v27  ;;  %v621_v30 = vunpack.c.l.s4 %v1980_v29  ;;  %v670_v53 = vsub.s32 0, %v2382_v41  ;;  %vm1288_vm3 = vcmask 1041409   ;;  %s1469_s27 = sshll.u32 %s2273_s4, 3  ;;  %s1493_s26 = sshll.u32 %s2040_s25, 7 }
  0xde   : > { %1515 = vmatmul.mubr.msk.bf16.vlgmr.msra.gmra.mrb[0].mxu0 %vm436_vm0, %v1471_v13  ;;  %1527 = vmatmul.mubr.msk.bf16.vlgmr.msra.gmra.mrb[0].mxu1 %vm436_vm0, %v1477_v14  ;;  %vm1290_vm4 = vcmask 1042434   ;;  %vm1292_vm5 = vcmask 1043459   ;;  %vm1294_vm6 = vcmask 1044484   ;;  %vm1296_vm7 = vcmask 1045509   ;;  %s361_s30 = scalar_lea.vmem [#allocation13], %s1469_s27  ;;  %s2536_s7 = scalar_lea.hbm %s2587_s6, %s1493_s26 }
  0xdf   : > { %1531 = vmatpush3.bf16.msra.mxu1 %v1645_v16  ;;  %1518 = vmatprep.mubr.msk.bf16.mxu0 %vm436_vm0, %v1472_v17  ;;  %v622_v40 = vunpack.c.0.s8 %v621_v30  ;;  %vm1298_vm8 = vcmask 1046534   ;;  %s1318_s12 = sshll.u32 %s361_s30, 4  ;;  %vm1300_vm9 = vcmask 1047559   ;;  %s1305_s2 = scalar_lea.sflag [#allocation4], %s2273_s4  ;;  %s2538_s12 = int_to_ptr.vmem [resolvable:$true] %s1318_s12 }
  0xe0   : > { %1532 = vmatprep.mubr.msk.bf16.mxu1 %vm1979_vm1, %v1978_v18  ;;  %s1886_s25 = scalar_lea.vmem %s2538_s12, 128  ;;  %p2621_p13 = scmp.ne.s32.totalorder %s2607_s17, 0 }
  0xe1   : > { %v625_v43 = vsub.s32 %v622_v40, %v2382_v41  ;;  %p1887_p2 = scmp.ne.s32.totalorder %s2538_s12, %s1886_s25  ;;  %s1983_s8 = smov [#allocation13]  }
  0xe2   : > { %s1890_s10 = sshll.u32 %s1983_s8, 4  ;;  %s1891_s10 = int_to_ptr.vmem [resolvable:$false] %s1890_s10 }
  0xe3   : > { %p1888_p0 = pnand %p1887_p2, %p2621_p13  ;;  %s1892_s11 = scalar_lea.vmem %s1891_s10, 256 }
  0xe4   : > { %p1893_p3 = scmp.lt.s32.totalorder %s2538_s12, %s1891_s10  ;;  %p1894_p8 = scmp.lt.s32.totalorder %s1892_s11, %s1886_s25 }
  0xe5   : > { %p1889_p6 = pneg %p1888_p0 }
  0xe6   : > { %1519 = vmatmul.mubr.msk.bf16.gmra.mrb[4].mxu0 %vm436_vm0, %v1473_v23  ;;  %1533 = vmatmul.mubr.msk.bf16.vlgmr.msra.gmra.mrb[4].mxu1 %vm574_vm2, %v558_v24  ;;  %p1895_p4 = por %p1894_p8, %p1893_p3 }
  0xe7   : > { %1522 = vmatprep.mubr.msk.bf16.mxu0 %vm436_vm0, %v1474_v25 }
  0xe8   : > { %p1896_p10 = pnand %p1895_p4, %p1889_p6 }
  0xee   : > { %1523 = vmatmul.mubr.msk.bf16.gmra.mrb[8].mxu0 %vm436_vm0, %v1475_v28 }
 0x1b1   : > { %v2376_v32 = vpop.f32.mrb[0].mxu1  ;;  %v1516_v33 = vpop.f32.mrb[0].mxu0 }
 0x1b2   : > { %v2378_v34 = vpop.f32.mrb[1].mxu1  ;;  %v495_v35 = vpop.f32.mrb[1].mxu0 }
 0x1b3   : > { %v2380_v36 = vpop.f32.mrb[2].mxu1  ;;  %v1517_v37 = vpop.f32.mrb[2].mxu0 }
 0x1b4   : > { %v546_v38 = vpop.f32.mrb[3].mxu1  ;;  %v498_v39 = vpop.f32.mrb[3].mxu0 }
 0x1b9   : > { %v612_v44 = vpop.f32.mrb[4].mxu1  ;;  %v1520_v45 = vpop.f32.mrb[4].mxu0 }
 0x1ba   : > { %v613_v46 = vadd.f32 %v1488_v42, %v612_v44  ;;  %v1534_v47 = vpop.f32.mrb[5].mxu1  ;;  %v511_v48 = vpop.f32.mrb[5].mxu0 }
 0x1bb   : > { %v615_v49 = vpop.f32.mrb[6].mxu1  ;;  %v1521_v50 = vpop.f32.mrb[6].mxu0 }
 0x1bc   : > { %v619_v51 = vcombine.high %v613_v46, %v613_v46  ;;  %v626_v52 = vrot.slane %v613_v46, %v625_v43  ;;  %v1535_v54 = vpop.f32.mrb[7].mxu1  ;;  %v514_v55 = vpop.f32.mrb[7].mxu0 }
 0x1be   : > { %v633_v56 = vrot.slane %v619_v51, %v625_v43  ;;  %v634_v57 = vcombine.high %v626_v52, %v626_v52  ;;  %v642_v58 = vrot.slane %v626_v52, %v625_v43 }
 0x1c0   : > { %v671_v59 = vrot.slane %v642_v58, %v670_v53  ;;  %v656_v60 = vrot.slane %v634_v57, %v625_v43  ;;  %v664_v61 = vcombine.high %v642_v58, %v642_v58  ;;  %v635_v62 = vcombine.high %v633_v56, %v633_v56 }
 0x1c1   : > { %v1524_v63 = vpop.f32.mrb[8].mxu0  ;;  %v649_v0 = vrot.slane %v633_v56, %v625_v43 }
 0x1c2   : > { %v708_v1 = vadd.f32 %v671_v59, %v495_v35  ;;  %v709_v5 = vadd.f32 %v671_v59, %v498_v39  ;;  %v666_v9 = vcombine.high %v656_v60, %v656_v60  ;;  %v675_v13 = vrot.slane %v656_v60, %v670_v53  ;;  %v527_v14 = vpop.f32.mrb[9].mxu0 }
 0x1c3   : > { %v679_v16 = vrot.slane %v664_v61, %v670_v53  ;;  %v663_v17 = vrot.slane %v635_v62, %v625_v43  ;;  %v665_v18 = vcombine.high %v649_v0, %v649_v0  ;;  %v687_v23 = vrot.slane %v649_v0, %v670_v53  ;;  %v1525_v24 = vpop.f32.mrb[10].mxu0  ;;  %v1491_v61 = vld [vmem:[#allocation11] ss:$0 sm:$0xff] }
 0x1c4   : > { %v683_v25 = vrot.slane %v666_v9, %v670_v53  ;;  %v530_v28 = vpop.f32.mrb[11].mxu0  ;;  %v724_v29 = vpack.c.bf16 %v709_v5, %v708_v1  ;;  %v710_v30 = vadd.f32 %v1516_v33, %v675_v13  ;;  %v711_v31 = vadd.f32 %v1517_v37, %v675_v13 }
 0x1c5   : > { %v712_v40 = vadd.f32 %v679_v16, %v511_v48  ;;  %v713_v42 = vadd.f32 %v679_v16, %v514_v55  ;;  %v667_v44 = vcombine.high %v663_v17, %v663_v17  ;;  %v691_v46 = vrot.slane %v663_v17, %v670_v53 }
 0x1c6   : > { %v714_v47 = vadd.f32 %v1520_v45, %v683_v25  ;;  %v715_v35 = vadd.f32 %v1521_v50, %v683_v25  ;;  %v695_v39 = vrot.slane %v665_v18, %v670_v53  ;;  %v716_v49 = vadd.f32 %v687_v23, %v527_v14 }
 0x1c7   : > { %v726_v51 = vpack.c.bf16 %v713_v42, %v712_v40  ;;  %v699_v52 = vrot.slane %v667_v44, %v670_v53  ;;  %v718_v54 = vadd.f32 %v1524_v63, %v691_v46  ;;  %v719_v43 = vadd.f32 %v1525_v24, %v691_v46 }
 0x1c8   : > { %v727_v56 = vpack.c.bf16 %v715_v35, %v714_v47  ;;  %v717_v57 = vadd.f32 %v687_v23, %v530_v28  ;;  %1650 = vtanh.bf16 %v724_v29  ;;  %v725_v58 = vpack.c.bf16 %v711_v31, %v710_v30 }
 0x1c9   : > { %1652 = vtanh.bf16 %v726_v51  ;;  %v729_v59 = vpack.c.bf16 %v719_v43, %v718_v54  ;;  %v720_v33 = vadd.f32 %v695_v39, %v2378_v34  ;;  %v721_v37 = vadd.f32 %v695_v39, %v546_v38 }
 0x1ca   : > { %1654 = vtanh.bf16 %v727_v56  ;;  %v728_v48 = vpack.c.bf16 %v717_v57, %v716_v49  ;;  %v722_v45 = vadd.f32 %v2376_v32, %v699_v52  ;;  %v723_v50 = vadd.f32 %v2380_v36, %v699_v52 }
 0x1cb   : > { %1656 = vtanh.bf16 %v729_v59  ;;  %v730_v55 = vpack.c.bf16 %v721_v37, %v720_v33 }
 0x1cc   : > { %1658 = vtanh.bf16 %v728_v48  ;;  %v731_v53 = vpack.c.bf16 %v723_v50, %v722_v45 }
 0x1cd   : > { %1660 = vtanh.bf16 %v725_v58 }
 0x1ce   : > { %1662 = vtanh.bf16 %v730_v55 }
 0x1cf   : > { %1664 = vtanh.bf16 %v731_v53 }
 0x1d3   : > { %v1651_v60 = vpop.eup %1650 }
 0x1d4   : > { %v1653_v62 = vpop.eup %1652  ;;  %v740_v63 = vunpack.c.l.bf16 %v1651_v60 }
 0x1d5   : > { %v1655_v0 = vpop.eup %1654  ;;  %v744_v34 = vunpack.c.l.bf16 %v1653_v62 }
 0x1d6   : > { %v1657_v38 = vpop.eup %1656  ;;  %v763_v1 = vmul.f32 %v1491_v61, %v740_v63  ;;  %v746_v5 = vunpack.c.l.bf16 %v1655_v0 }
 0x1d7   : > { %v1659_v9 = vpop.eup %1658  ;;  %v767_v32 = vmul.f32 %v1491_v61, %v744_v34  ;;  %v750_v16 = vunpack.c.l.bf16 %v1657_v38 }
 0x1d8   : > { %v1661_v13 = vpop.eup %1660  ;;  %v779_v36 = vsel %vm436_vm0, %v763_v1, 0.0  ;;  %v769_v14 = vmul.f32 %v1491_v61, %v746_v5  ;;  %v748_v24 = vunpack.c.l.bf16 %v1659_v9 }
 0x1d9   : > { %v1663_v17 = vpop.eup %1662  ;;  %780 = vadd.xlane.f32.xlu0 %v779_v36  ;;  %v791_v18 = vsel %vm436_vm0, %v767_v32, 0.0  ;;  %v742_v23 = vunpack.c.l.bf16 %v1661_v13  ;;  %v773_v30 = vmul.f32 %v1491_v61, %v750_v16 }
 0x1da   : > { %v1665_v25 = vpop.eup %1664  ;;  %792 = vadd.xlane.f32.xlu1 %v791_v18  ;;  %v797_v29 = vsel %vm436_vm0, %v769_v14, 0.0  ;;  %v771_v40 = vmul.f32 %v1491_v61, %v748_v24  ;;  %v752_v42 = vunpack.c.l.bf16 %v1663_v17 }
 0x1db   : > { %v765_v28 = vmul.f32 %v1491_v61, %v742_v23  ;;  %v754_v44 = vunpack.c.l.bf16 %v1665_v25  ;;  %v809_v47 = vsel %vm436_vm0, %v773_v30, 0.0 }
 0x1dc   : > { %v803_v46 = vsel %vm436_vm0, %v771_v40, 0.0  ;;  %v775_v35 = vmul.f32 %v1491_v61, %v752_v42 }
 0x1dd   : > { %v785_v31 = vsel %vm436_vm0, %v765_v28, 0.0  ;;  %v777_v39 = vmul.f32 %v1491_v61, %v754_v44 }
 0x1de   : > { %786 = vadd.xlane.f32.xlu0 %v785_v31  ;;  %798 = vadd.xlane.f32.xlu1 %v797_v29  ;;  %v815_v49 = vsel %vm436_vm0, %v775_v35, 0.0 }
 0x1df   : > { %v821_v51 = vsel %vm436_vm0, %v777_v39, 0.0 }
 0x1e2   : > { %804 = vadd.xlane.f32.xlu0 %v803_v46  ;;  %810 = vadd.xlane.f32.xlu1 %v809_v47 }
 0x1e6   : > { %816 = vadd.xlane.f32.xlu0 %v815_v49  ;;  %822 = vadd.xlane.f32.xlu1 %v821_v51 }
 0x266   : > { %v781_v52 = vpop.xlane.xlu0 %780 }
 0x267   : > { %v848_v54 = vmax.f32 %v781_v52, -1e+09  ;;  %v793_v43 = vpop.xlane.xlu1 %792 }
 0x268   : > { %v862_v56 = vmax.f32 %v793_v43, -1e+09 }
 0x269   : > { %v849_v57 = vrot.slane %v848_v54, 4 }
 0x26a   : > { %v863_v58 = vrot.slane %v862_v56, 4 }
 0x26b   : > { %v850_v59 = vmax.f32 %v848_v54, %v849_v57  ;;  %v787_v33 = vpop.xlane.xlu0 %786  ;;  %v799_v37 = vpop.xlane.xlu1 %798 }
 0x26c   : > { %v864_v48 = vmax.f32 %v862_v56, %v863_v58  ;;  %v855_v45 = vmax.f32 %v787_v33, -1e+09  ;;  %v869_v50 = vmax.f32 %v799_v37, -1e+09 }
 0x26d   : > { %v851_v55 = vrot.slane %v850_v59, 2 }
 0x26e   : > { %v865_v53 = vrot.slane %v864_v48, 2  ;;  %v856_v60 = vrot.slane %v855_v45, 4  ;;  %v870_v61 = vrot.slane %v869_v50, 4 }
 0x26f   : > { %v852_v62 = vmax.f32 %v850_v59, %v851_v55  ;;  %v2397_v63 = vpop.xlane.xlu0 %804  ;;  %v2399_v0 = vpop.xlane.xlu1 %810 }
 0x270   : > { %v866_v34 = vmax.f32 %v864_v48, %v865_v53  ;;  %v857_v38 = vmax.f32 %v855_v45, %v856_v60  ;;  %v871_v1 = vmax.f32 %v869_v50, %v870_v61  ;;  %v876_v5 = vmax.f32 %v2397_v63, -1e+09 }
 0x271   : > { %v853_v9 = vrot.slane %v852_v62, 1  ;;  %v883_v32 = vmax.f32 %v2399_v0, -1e+09 }
 0x272   : > { %v867_v13 = vrot.slane %v866_v34, 1  ;;  %v858_v36 = vrot.slane %v857_v38, 2  ;;  %v872_v14 = vrot.slane %v871_v1, 2  ;;  %v877_v16 = vrot.slane %v876_v5, 4 }
 0x273   : > { %v854_v17 = vmax.f32 %v852_v62, %v853_v9  ;;  %v884_v18 = vrot.slane %v883_v32, 4  ;;  %v2403_v23 = vpop.xlane.xlu0 %816  ;;  %v2406_v62 = vpop.xlane.xlu1 %822 }
 0x274   : > { %v868_v24 = vmax.f32 %v866_v34, %v867_v13  ;;  %v859_v25 = vmax.f32 %v857_v38, %v858_v36  ;;  %v873_v28 = vmax.f32 %v871_v1, %v872_v14  ;;  %v878_v29 = vmax.f32 %v876_v5, %v877_v16 }
 0x275   : > { %v904_v30 = vsub.f32 %v781_v52, %v854_v17  ;;  %v905_v31 = vsub.f32 -1e+09, %v854_v17  ;;  %v885_v40 = vmax.f32 %v883_v32, %v884_v18  ;;  %v890_v42 = vmax.f32 %v2403_v23, -1e+09 }
 0x276   : > { %v908_v44 = vsub.f32 %v793_v43, %v868_v24  ;;  %v909_v46 = vsub.f32 -1e+09, %v868_v24  ;;  %v860_v47 = vrot.slane %v859_v25, 1  ;;  %v874_v35 = vrot.slane %v873_v28, 1 }
 0x277   : > { %v920_v39 = vmul.f32 1.442695, %v904_v30  ;;  %v922_v49 = vmul.f32 1.442695, %v905_v31  ;;  %v879_v51 = vrot.slane %v878_v29, 2  ;;  %v886_v54 = vrot.slane %v885_v40, 2 }
 0x278   : > { %v928_v56 = vmul.f32 1.442695, %v908_v44  ;;  %v930_v57 = vmul.f32 1.442695, %v909_v46  ;;  %v861_v58 = vmax.f32 %v859_v25, %v860_v47  ;;  %v875_v59 = vmax.f32 %v873_v28, %v874_v35 }
 0x279   : > { %1666 = vpow2.f32 %v920_v39  ;;  %v880_v48 = vmax.f32 %v878_v29, %v879_v51  ;;  %v887_v45 = vmax.f32 %v885_v40, %v886_v54  ;;  %v891_v52 = vrot.slane %v890_v42, 4 }
 0x27a   : > { %1668 = vpow2.f32 %v922_v49  ;;  %v906_v50 = vsub.f32 %v787_v33, %v861_v58  ;;  %v907_v55 = vsub.f32 -1e+09, %v861_v58  ;;  %v910_v53 = vsub.f32 %v799_v37, %v875_v59 }
 0x27b   : > { %1670 = vpow2.f32 %v928_v56  ;;  %v911_v43 = vsub.f32 -1e+09, %v875_v59  ;;  %v881_v60 = vrot.slane %v880_v48, 1  ;;  %v888_v61 = vrot.slane %v887_v45, 1 }
 0x27c   : > { %1672 = vpow2.f32 %v930_v57  ;;  %v924_v34 = vmul.f32 1.442695, %v906_v50  ;;  %v926_v38 = vmul.f32 1.442695, %v907_v55  ;;  %v932_v1 = vmul.f32 1.442695, %v910_v53 }
 0x27d   : > { %v934_v5 = vmul.f32 1.442695, %v911_v43  ;;  %v882_v9 = vmax.f32 %v880_v48, %v881_v60  ;;  %v889_v32 = vmax.f32 %v887_v45, %v888_v61  ;;  %v892_v13 = vmax.f32 %v890_v42, %v891_v52 }
 0x27e   : > { %1674 = vpow2.f32 %v924_v34  ;;  %v897_v36 = vmax.f32 %v2406_v62, -1e+09 }
 0x27f   : > { %1676 = vpow2.f32 %v926_v38  ;;  %v912_v33 = vsub.f32 %v2397_v63, %v882_v9  ;;  %v913_v37 = vsub.f32 -1e+09, %v882_v9  ;;  %v914_v14 = vsub.f32 %v2399_v0, %v889_v32 }
 0x280   : > { %1678 = vpow2.f32 %v932_v1  ;;  %v915_v16 = vsub.f32 -1e+09, %v889_v32  ;;  %v893_v17 = vrot.slane %v892_v13, 2  ;;  %v898_v18 = vrot.slane %v897_v36, 4 }
 0x281   : > { %1680 = vpow2.f32 %v934_v5  ;;  %v936_v24 = vmul.f32 1.442695, %v912_v33  ;;  %v938_v25 = vmul.f32 1.442695, %v913_v37  ;;  %v940_v28 = vmul.f32 1.442695, %v914_v14 }
 0x282   : > { %v942_v29 = vmul.f32 1.442695, %v915_v16  ;;  %v894_v30 = vmax.f32 %v892_v13, %v893_v17  ;;  %v899_v31 = vmax.f32 %v897_v36, %v898_v18 }
 0x283   : > { %v2411_v40 = vpop.eup %1666  ;;  %1682 = vpow2.f32 %v936_v24 }
 0x284   : > { %v2413_v42 = vpop.eup %1668  ;;  %1684 = vpow2.f32 %v938_v25  ;;  %v895_v63 = vrot.slane %v894_v30, 1  ;;  %v900_v44 = vrot.slane %v899_v31, 2 }
 0x285   : > { %v2415_v0 = vpop.eup %1670  ;;  %v952_v46 = vadd.f32 %v2413_v42, %v2411_v40  ;;  %1686 = vpow2.f32 %v940_v28 }
 0x286   : > { %v2419_v47 = vpop.eup %1672  ;;  %1688 = vpow2.f32 %v942_v29  ;;  %v896_v35 = vmax.f32 %v894_v30, %v895_v63  ;;  %v901_v39 = vmax.f32 %v899_v31, %v900_v44 }
 0x287   : > { %v953_v49 = vrot.slane %v952_v46, 4  ;;  %v966_v51 = vadd.f32 %v2419_v47, %v2415_v0 }
 0x288   : > { %v2423_v54 = vpop.eup %1674  ;;  %v916_v56 = vsub.f32 %v2403_v23, %v896_v35  ;;  %v917_v57 = vsub.f32 -1e+09, %v896_v35  ;;  %v902_v58 = vrot.slane %v901_v39, 1 }
 0x289   : > { %v2426_v59 = vpop.eup %1676  ;;  %v954_v48 = vadd.f32 %v953_v49, %v952_v46  ;;  %v967_v45 = vrot.slane %v966_v51, 4 }
 0x28a   : > { %v2428_v52 = vpop.eup %1678  ;;  %v959_v50 = vadd.f32 %v2426_v59, %v2423_v54  ;;  %v944_v55 = vmul.f32 1.442695, %v916_v56  ;;  %v946_v53 = vmul.f32 1.442695, %v917_v57  ;;  %v903_v43 = vmax.f32 %v901_v39, %v902_v58 }
 0x28b   : > { %v2432_v60 = vpop.eup %1680  ;;  %v955_v61 = vrot.slane %v954_v48, 2  ;;  %v968_v34 = vadd.f32 %v967_v45, %v966_v51  ;;  %v1981_v58 = vmov 839922192  }
 0x28c   : > { %v960_v38 = vrot.slane %v959_v50, 4  ;;  %v973_v23 = vadd.f32 %v2432_v60, %v2428_v52  ;;  %1690 = vpow2.f32 %v944_v55  ;;  %v918_v1 = vsub.f32 %v2406_v62, %v903_v43 }
 0x28d   : > { %v2437_v5 = vpop.eup %1682  ;;  %v956_v9 = vadd.f32 %v955_v61, %v954_v48  ;;  %v969_v32 = vrot.slane %v968_v34, 2  ;;  %1692 = vpow2.f32 %v946_v53  ;;  %v919_v13 = vsub.f32 -1e+09, %v903_v43 }
 0x28e   : > { %v2439_v36 = vpop.eup %1684  ;;  %v961_v33 = vadd.f32 %v960_v38, %v959_v50  ;;  %v974_v37 = vrot.slane %v973_v23, 4  ;;  %v948_v14 = vmul.f32 1.442695, %v918_v1  ;;  %v1049_v48 = vunpack.c.l.s4 %v1981_v58 }
 0x28f   : > { %v2441_v16 = vpop.eup %1686  ;;  %v957_v17 = vrot.slane %v956_v9, 1  ;;  %v970_v18 = vadd.f32 %v969_v32, %v968_v34  ;;  %v980_v24 = vadd.f32 %v2439_v36, %v2437_v5  ;;  %v950_v25 = vmul.f32 1.442695, %v919_v13 }
 0x290   : > { %v2445_v62 = vpop.eup %1688  ;;  %v962_v28 = vrot.slane %v961_v33, 2  ;;  %v975_v29 = vadd.f32 %v974_v37, %v973_v23  ;;  %1694 = vpow2.f32 %v948_v14  ;;  %v1982_v53 = vmov 1985246804  }
 0x291   : > { %v958_v30 = vadd.f32 %v957_v17, %v956_v9  ;;  %v971_v31 = vrot.slane %v970_v18, 1  ;;  %v981_v63 = vrot.slane %v980_v24, 4  ;;  %v987_v44 = vadd.f32 %v2445_v62, %v2441_v16 }
 0x292   : > { %v963_v46 = vadd.f32 %v962_v28, %v961_v33  ;;  %v976_v35 = vrot.slane %v975_v29, 2  ;;  %1696 = vpow2.f32 %v950_v25  ;;  %v1056_v43 = vunpack.c.l.s4 %v1982_v53 }
 0x293   : > { %1698 = vrcp.f32 %v958_v30  ;;  %v972_v39 = vadd.f32 %v971_v31, %v970_v18  ;;  %v982_v49 = vadd.f32 %v981_v63, %v980_v24  ;;  %v988_v51 = vrot.slane %v987_v44, 4 }
 0x294   : > { %v964_v56 = vrot.slane %v963_v46, 1  ;;  %v977_v57 = vadd.f32 %v976_v35, %v975_v29  ;;  %v1050_v13 = vunpack.c.0.s8 %v1049_v48  ;;  %v1057_v17 = vunpack.c.0.s8 %v1056_v43 }
 0x295   : > { %1700 = vrcp.f32 %v972_v39  ;;  %v983_v45 = vrot.slane %v982_v49, 2  ;;  %v989_v50 = vadd.f32 %v988_v51, %v987_v44 }
 0x296   : > { %v2449_v55 = vpop.eup %1690  ;;  %v965_v61 = vadd.f32 %v964_v56, %v963_v46  ;;  %v978_v34 = vrot.slane %v977_v57, 1  ;;  %v2460_v31 = vsub.s32 %v1050_v13, %v2382_v41  ;;  %v2465_v46 = vsub.s32 %v1057_v17, %v2382_v41 }
 0x297   : > { %v2451_v38 = vpop.eup %1692  ;;  %v984_v23 = vadd.f32 %v983_v45, %v982_v49  ;;  %v990_v1 = vrot.slane %v989_v50, 2 }
 0x298   : > { %1702 = vrcp.f32 %v965_v61  ;;  %v979_v9 = vadd.f32 %v978_v34, %v977_v57  ;;  %v994_v32 = vadd.f32 %v2451_v38, %v2449_v55 }
 0x299   : > { %v985_v33 = vrot.slane %v984_v23, 1  ;;  %v991_v37 = vadd.f32 %v990_v1, %v989_v50 }
 0x29a   : > { %v2455_v14 = vpop.eup %1694  ;;  %1704 = vrcp.f32 %v979_v9  ;;  %v995_v18 = vrot.slane %v994_v32, 4 }
 0x29b   : > { %v986_v24 = vadd.f32 %v985_v33, %v984_v23  ;;  %v992_v25 = vrot.slane %v991_v37, 1 }
 0x29c   : > { %v2457_v28 = vpop.eup %1696  ;;  %v996_v29 = vadd.f32 %v995_v18, %v994_v32 }
 0x29d   : > { %v1699_v30 = vpop.eup %1698  ;;  %1706 = vrcp.f32 %v986_v24  ;;  %v993_v63 = vadd.f32 %v992_v25, %v991_v37  ;;  %v1001_v44 = vadd.f32 %v2457_v28, %v2455_v14 }
 0x29e   : > { %v1016_v35 = vmul.f32 %v1699_v30, %v2411_v40  ;;  %v1017_v39 = vmul.f32 %v1699_v30, %v2413_v42  ;;  %v997_v49 = vrot.slane %v996_v29, 2 }
 0x29f   : > { %v1701_v51 = vpop.eup %1700  ;;  %1708 = vrcp.f32 %v993_v63  ;;  %v1002_v45 = vrot.slane %v1001_v44, 4 }
 0x2a0   : > { %v1032_v56 = vpack.c.bf16 %v1017_v39, %v1016_v35  ;;  %v1020_v57 = vmul.f32 %v1701_v51, %v2415_v0  ;;  %v1021_v58 = vmul.f32 %v1701_v51, %v2419_v47  ;;  %v998_v48 = vadd.f32 %v997_v49, %v996_v29 }
 0x2a2   : > { %v1703_v50 = vpop.eup %1702  ;;  %v1054_v53 = vrot.slane %v1032_v56, %v2460_v31  ;;  %v1061_v41 = vrot.slane %v1032_v56, %v2465_v46  ;;  %v1034_v43 = vpack.c.bf16 %v1021_v58, %v1020_v57  ;;  %v999_v61 = vrot.slane %v998_v48, 1 }
 0x2a3   : > { %v1018_v40 = vmul.f32 %v1703_v50, %v2423_v54  ;;  %v1019_v42 = vmul.f32 %v1703_v50, %v2426_v59  ;;  %v1003_v54 = vadd.f32 %v1002_v45, %v1001_v44 }
 0x2a4   : > { %v1705_v34 = vpop.eup %1704  ;;  %v1176_v23 = vmul.bf16 %v1054_v53, %v2304_v2  ;;  %v1177_v0 = vmul.bf16 %v1061_v41, %v2307_v3  ;;  %v1082_v47 = vrot.slane %v1034_v43, %v2460_v31  ;;  %v1089_v1 = vrot.slane %v1034_v43, %v2465_v46 }
 0x2a5   : > { %v1033_v9 = vpack.c.bf16 %v1019_v42, %v1018_v40  ;;  %v1022_v32 = vmul.f32 %v1705_v34, %v2428_v52  ;;  %v1023_v13 = vmul.f32 %v1705_v34, %v2432_v60  ;;  %v1000_v33 = vadd.f32 %v999_v61, %v998_v48 }
 0x2a6   : > { %v1192_v37 = vunpack.c.l.bf16 %v1176_v23  ;;  %v1193_v17 = vunpack.c.l.bf16 %v1177_v0  ;;  %v1180_v3 = vmul.bf16 %v1082_v47, %v2333_v12  ;;  %v1181_v25 = vmul.bf16 %v1089_v1, %v2341_v15 }
 0x2a7   : > { %v1707_v18 = vpop.eup %1706  ;;  %v1068_v59 = vrot.slane %v1033_v9, %v2460_v31  ;;  %v1075_v2 = vrot.slane %v1033_v9, %v2465_v46  ;;  %v1035_v24 = vpack.c.bf16 %v1023_v13, %v1022_v32  ;;  %1710 = vrcp.f32 %v1000_v33 }
 0x2a8   : > { %v1208_v30 = vsel %vm436_vm0, %v1192_v37, 0.0  ;;  %v1209_v63 = vsel %vm436_vm0, %v1193_v17, 0.0  ;;  %v1024_v35 = vmul.f32 %v1707_v18, %v2437_v5  ;;  %v1004_v12 = vrot.slane %v1003_v54, 2 }
 0x2a9   : > { %v1178_v29 = vmul.bf16 %v1068_v59, %v2318_v7  ;;  %v1179_v52 = vmul.bf16 %v1075_v2, %v2321_v8  ;;  %v1096_v60 = vrot.slane %v1035_v24, %v2460_v31  ;;  %v1103_v44 = vrot.slane %v1035_v24, %v2465_v46  ;;  %v1709_v39 = vpop.eup %1708 }
 0x2aa   : > { %v1196_v56 = vunpack.c.l.bf16 %v1180_v3  ;;  %v1025_v8 = vmul.f32 %v1707_v18, %v2439_v36  ;;  %v1210_v57 = vadd.f32 %v1209_v63, %v1208_v30  ;;  %v1197_v58 = vunpack.c.l.bf16 %v1181_v25 }
 0x2ab   : > { %v1194_v49 = vunpack.c.l.bf16 %v1178_v29  ;;  %v1195_v51 = vunpack.c.l.bf16 %v1179_v52  ;;  %v1182_v15 = vmul.bf16 %v1096_v60, %v2349_v19  ;;  %v1183_v7 = vmul.bf16 %v1103_v44, %v2352_v20 }
 0x2ac   : > { %v1036_v5 = vpack.c.bf16 %v1025_v8, %v1024_v35  ;;  %v1026_v41 = vmul.f32 %v1709_v39, %v2441_v16  ;;  %v1027_v61 = vmul.f32 %v1709_v39, %v2445_v62  ;;  %v1226_v19 = vsel %vm436_vm0, %v1196_v56, 0.0 }
 0x2ad   : > { %v1217_v48 = vsel %vm436_vm0, %v1194_v49, 0.0  ;;  %v1218_v45 = vsel %vm436_vm0, %v1195_v51, 0.0  ;;  %v1198_v50 = vunpack.c.l.bf16 %v1182_v15  ;;  %v1199_v53 = vunpack.c.l.bf16 %v1183_v7 }
 0x2ae   : > { %v1219_v43 = vadd.f32 %v1218_v45, %v1217_v48  ;;  %v1110_v20 = vrot.slane %v1036_v5, %v2460_v31  ;;  %v1211_v36 = vrot.slane %v1210_v57, 4  ;;  %v1227_v42 = vsel %vm436_vm0, %v1197_v58, 0.0 }
 0x2af   : > { %v1117_v34 = vrot.slane %v1036_v5, %v2465_v46  ;;  %v1005_v23 = vadd.f32 %v1004_v12, %v1003_v54  ;;  %v1235_v0 = vsel %vm436_vm0, %v1198_v50, 0.0  ;;  %v1236_v47 = vsel %vm436_vm0, %v1199_v53, 0.0 }
 0x2b0   : > { %v1184_v16 = vmul.bf16 %v1110_v20, %v2355_v21  ;;  %v1037_v1 = vpack.c.bf16 %v1027_v61, %v1026_v41  ;;  %v1220_v9 = vrot.slane %v1219_v43, 4  ;;  %v1228_v13 = vadd.f32 %v1227_v42, %v1226_v19 }
 0x2b1   : > { %v1711_v40 = vpop.eup %1710  ;;  %v1185_v62 = vmul.bf16 %v1117_v34, %v2358_v22  ;;  %v1237_v18 = vadd.f32 %v1236_v47, %v1235_v0  ;;  %v1006_v2 = vrot.slane %v1005_v23, 1  ;;  %v1212_v24 = vadd.f32 %v1211_v36, %v1210_v57 }
 0x2b2   : > { %v1028_v32 = vmul.f32 %v1711_v40, %v2449_v55  ;;  %v1200_v33 = vunpack.c.l.bf16 %v1184_v16  ;;  %v1124_v37 = vrot.slane %v1037_v1, %v2460_v31  ;;  %v1131_v17 = vrot.slane %v1037_v1, %v2465_v46 }
 0x2b3   : > { %v1201_v54 = vunpack.c.l.bf16 %v1185_v62  ;;  %v1029_v59 = vmul.f32 %v1711_v40, %v2451_v38  ;;  %v1221_v25 = vadd.f32 %v1220_v9, %v1219_v43  ;;  %v1007_v52 = vadd.f32 %v1006_v2, %v1005_v23 }
 0x2b4   : > { %v1244_v21 = vsel %vm436_vm0, %v1200_v33, 0.0  ;;  %v1186_v3 = vmul.bf16 %v1124_v37, %v2368_v26  ;;  %v1187_v22 = vmul.bf16 %v1131_v17, %v2371_v27  ;;  %v1229_v60 = vrot.slane %v1228_v13, 4 }
 0x2b5   : > { %v1245_v55 = vsel %vm436_vm0, %v1201_v54, 0.0  ;;  %v1038_v29 = vpack.c.bf16 %v1029_v59, %v1028_v32  ;;  %v1238_v35 = vrot.slane %v1237_v18, 4  ;;  %1712 = vrcp.f32 %v1007_v52 }
 0x2b6   : > { %v1246_v30 = vadd.f32 %v1245_v55, %v1244_v21  ;;  %v1202_v63 = vunpack.c.l.bf16 %v1186_v3  ;;  %v1203_v44 = vunpack.c.l.bf16 %v1187_v22  ;;  %v1222_v27 = vrot.slane %v1221_v25, 2 }
 0x2b7   : > { %v1138_v38 = vrot.slane %v1038_v29, %v2460_v31  ;;  %v1145_v39 = vrot.slane %v1038_v29, %v2465_v46  ;;  %v1230_v15 = vadd.f32 %v1229_v60, %v1228_v13  ;;  %v1213_v8 = vrot.slane %v1212_v24, 2 }
 0x2b8   : > { %v1253_v49 = vsel %vm436_vm0, %v1202_v63, 0.0  ;;  %v1254_v26 = vsel %vm436_vm0, %v1203_v44, 0.0  ;;  %v1247_v7 = vrot.slane %v1246_v30, 4  ;;  %v1239_v57 = vadd.f32 %v1238_v35, %v1237_v18 }
 0x2b9   : > { %v1255_v51 = vadd.f32 %v1254_v26, %v1253_v49  ;;  %v1188_v12 = vmul.bf16 %v1138_v38, %v2310_v4  ;;  %v1189_v56 = vmul.bf16 %v1145_v39, %v2315_v6  ;;  %v1223_v45 = vadd.f32 %v1222_v27, %v1221_v25 }
 0x2ba   : > { %v1231_v41 = vrot.slane %v1230_v15, 2  ;;  %v1248_v61 = vadd.f32 %v1247_v7, %v1246_v30  ;;  %v1214_v19 = vadd.f32 %v1213_v8, %v1212_v24  ;;  %v1240_v20 = vrot.slane %v1239_v57, 2 }
 0x2bb   : > { %v1204_v58 = vunpack.c.l.bf16 %v1188_v12  ;;  %v1205_v48 = vunpack.c.l.bf16 %v1189_v56  ;;  %v1256_v5 = vrot.slane %v1255_v51, 4  ;;  %v1224_v6 = vrot.slane %v1223_v45, 1 }
 0x2bc   : > { %v1232_v42 = vadd.f32 %v1231_v41, %v1230_v15  ;;  %v1249_v0 = vrot.slane %v1248_v61, 2  ;;  %v1215_v47 = vrot.slane %v1214_v19, 1  ;;  %v1241_v16 = vadd.f32 %v1240_v20, %v1239_v57 }
 0x2bd   : > { %v1262_v50 = vsel %vm436_vm0, %v1204_v58, 0.0  ;;  %v1263_v53 = vsel %vm436_vm0, %v1205_v48, 0.0  ;;  %v1257_v36 = vadd.f32 %v1256_v5, %v1255_v51  ;;  %v1225_v62 = vadd.f32 %v1224_v6, %v1223_v45 }
 0x2be   : > { %v1264_v43 = vadd.f32 %v1263_v53, %v1262_v50  ;;  %v1233_v37 = vrot.slane %v1232_v42, 1  ;;  %v1250_v17 = vadd.f32 %v1249_v0, %v1248_v61  ;;  %v1216_v18 = vadd.f32 %v1215_v47, %v1214_v19 }
 0x2bf   : > { %v1713_v40 = vpop.eup %1712  ;;  %v1258_v32 = vrot.slane %v1257_v36, 2  ;;  %v1242_v54 = vrot.slane %v1241_v16, 1 }
 0x2c0   : > { %v1265_v4 = vrot.slane %v1264_v43, 4  ;;  %v1030_v34 = vmul.f32 %v1713_v40, %v2455_v14  ;;  %v1031_v23 = vmul.f32 %v1713_v40, %v2457_v28  ;;  %v1289_v24 = vsel %vm1288_vm3, %v1225_v62, %v1216_v18 }
 0x2c1   : > { %v1259_v2 = vadd.f32 %v1258_v32, %v1257_v36  ;;  %v1234_v22 = vadd.f32 %v1233_v37, %v1232_v42  ;;  %v1251_v25 = vrot.slane %v1250_v17, 1 }
 0x2c2   : > { %v1039_v1 = vpack.c.bf16 %v1031_v23, %v1030_v34  ;;  %v1266_v9 = vadd.f32 %v1265_v4, %v1264_v43 }
 0x2c3   : > { %v1291_v52 = vsel %vm1290_vm4, %v1234_v22, %v1289_v24 }
 0x2c4   : > { %v1152_v13 = vrot.slane %v1039_v1, %v2460_v31  ;;  %v1159_v33 = vrot.slane %v1039_v1, %v2465_v46  ;;  %v1267_v59 = vrot.slane %v1266_v9, 2  ;;  %v1243_v31 = vadd.f32 %v1242_v54, %v1241_v16 }
 0x2c6   : > { %v1190_v14 = vmul.bf16 %v1152_v13, %v2326_v10  ;;  %v1191_v28 = vmul.bf16 %v1159_v33, %v2329_v11  ;;  %v1268_v29 = vadd.f32 %v1267_v59, %v1266_v9  ;;  %v1260_v10 = vrot.slane %v1259_v2, 1 }
 0x2c7   : > { %v1252_v11 = vadd.f32 %v1251_v25, %v1250_v17  ;;  %v1293_v63 = vsel %vm1292_vm5, %v1243_v31, %v1291_v52 }
 0x2c8   : > { %v1206_v21 = vunpack.c.l.bf16 %v1190_v14  ;;  %v1207_v3 = vunpack.c.l.bf16 %v1191_v28  ;;  %v1269_v44 = vrot.slane %v1268_v29, 1  ;;  %v1261_v35 = vadd.f32 %v1260_v10, %v1259_v2 }
 0x2c9   : > { %v1295_v39 = vsel %vm1294_vm6, %v1252_v11, %v1293_v63 }
 0x2ca   : > { %v1271_v46 = vsel %vm436_vm0, %v1206_v21, 0.0  ;;  %v1272_v55 = vsel %vm436_vm0, %v1207_v3, 0.0  ;;  %v1270_v26 = vadd.f32 %v1269_v44, %v1268_v29  ;;  %v1297_v51 = vsel %vm1296_vm7, %v1261_v35, %v1295_v39 }
 0x2cb   : > { %v1273_v60 = vadd.f32 %v1272_v55, %v1271_v46 }
 0x2cc   : > { %v1299_v56 = vsel %vm1298_vm8, %v1270_v26, %v1297_v51 }
 0x2cd   : > { %v1274_v30 = vrot.slane %v1273_v60, 4 }
 0x2cf   : > { %v1275_v38 = vadd.f32 %v1274_v30, %v1273_v60 }
 0x2d1   : > { %v1276_v49 = vrot.slane %v1275_v38, 2 }
 0x2d3   : > { %v1277_v27 = vadd.f32 %v1276_v49, %v1275_v38 }
 0x2d5   : > { %v1278_v12 = vrot.slane %v1277_v27, 1 }
 0x2d7   : > { %v1279_v15 = vadd.f32 %v1278_v12, %v1277_v27 }
 0x2d9   : > { %v1301_v7 = vsel %vm1300_vm9, %v1279_v15, %v1299_v56 }
 0x2da   : > { %1303 = vst.msk [vmem:[%s361_s30] sm:$0xff] %vm436_vm0, %v1301_v7 }
 0x2db   : > { %1899 = shalt.err (!%p1896_p10)
}
 0x2dc   : > { %s1900_s4 = scalar_lea.hbm %s2536_s7, 128  ;;  %s1904_s9 = scalar_lea.hbm %s2587_s6, 256 }
 0x2dd   : > { %p1901_p11 = scmp.ne.s32.totalorder %s2536_s7, %s1900_s4  ;;  %p1905_p7 = scmp.lt.u32.totalorder %s2536_s7, %s2587_s6 }
 0x2de   : > { %p1906_p12 = scmp.lt.u32.totalorder %s1904_s9, %s1900_s4  ;;  %p1908_p2 = scmp.lt.u32.totalorder %s1900_s4, %s2536_s7 }
 0x2df   : > { %p1902_p9 = pnand %p1901_p11, %p2621_p13 }
 0x2e0   : > { %p1907_p1 = por %p1906_p12, %p1905_p7 }
 0x2e1   : > { %p1903_p5 = pneg %p1902_p9 }
 0x2e2   : > { %p1909_p0 = por %p1908_p2, %p1907_p1 }
 0x2e4   : > { %p1910_p6 = pnand %p1909_p0, %p1903_p5 }
 0x2e6   : > { %1913 = shalt.err (!%p1910_p6)
}
 0x2e7   : > { %1560 = dma.vmem_to_hbm [thread:$0]  (%p2621_p13), %s2538_s12, 128, %s2536_s7, %s1305_s2  }
 0x2e8 PF: > { %s1330_s29 = sand.u32 1, %s1956_s21   ;;  %p2622_p3 = scmp.ne.s32.totalorder %s2599_s28, 0 }
 0x2e9   : > { %p2623_p8 = scmp.ge.s32.totalorder %s1968_s24, 2  ;;  %s1331_s14 = scalar_lea.sflag [#allocation4], %s1330_s29 }
 0x2eb   : > { %p1583_p4 = pnand %p2623_p8, %p2622_p3 }
 0x2ed   : > { %1951 = dma.done.wait (!%p1583_p4), %s1331_s14, 128  }
 0x2ee   : > { %1953 = vsyncadd (!%p1583_p4), %s1331_s14, 4294967168  ;;  %p24_p10 = scmp.ge.s32.totalorder %s2174_s18, 4   ;;  %s2624_s21 = smov %s1960_s22 }
 0x2ef   : > { %s2625_s22 = smov %s1964_s23  ;;  %s2626_s23 = smov %s2190_s19 }
 0x2f0   : > { %s2627_s24 = smov %s2174_s18  ;;  %26 = sbr.rel (!%p24_p10) target bundleno = 14 (0xe), region = 118 }
 0x2f7   :  { %1336 = vsyncpa [#allocation3], 1 }
 0x2f8   :  { %1338 = vsyncpa [#allocation3 + $0x1], 1 }
 0x2f9   :  { %1339 = vsyncpa [#allocation6], 1 }
 0x2fa   :  { %1341 = vsyncpa [#allocation6 + $0x1], 1 }
 0x2fb   :  { %1342 = vsyncpa [#allocation9], 1 }
 0x2fc   :  { %1343 = vsyncpa [#allocation12], 1 }
 0x2fd   :  { %1344 = vsyncpa [#allocation4], 1 }
 0x2fe   :  { %1346 = vsyncpa [#allocation4 + $0x1], 1 }

</bundles_post_ra>
